<compile_context>
chip_gen: v6e
topology: v6e:2x2x1
jax: 0.10.0
libtpu: 0.0.40
codegen_flags: <defaults>
</compile_context>

<pallas_src>
import jax
import jax.numpy as jnp
from jax.experimental import pallas as pl
from jax.experimental.pallas import tpu as pltpu


# ----------------------------------------------------------------------------
# Fused Pallas kernel: grid = (num_layer,), state carried in VMEM scratch.
# ----------------------------------------------------------------------------
def fused_gnn_kernel(h0_ref, vn0_ref, pbatch_ref, padd_ref, pmean_ref,
                     gsrc_ref, gdstT_ref, eattr_ref,
                     we_ref, be_ref, w1_ref, b1_ref, w2_ref, b2_ref, eps1_ref,
                     wv1_ref, bv1_ref, wv2_ref, bv2_ref,
                     wp_ref, bp_ref,
                     out_ref,
                     h_sc, vn_sc):
    l = pl.program_id(0)
    num_layer = pl.num_programs(0)

    # Initialize the carried node / virtual-node state at the first layer.
    @pl.when(l == 0)
    def _init():
        h_sc[...] = h0_ref[...]
        vn_sc[...] = vn0_ref[...]

    h = h_sc[...]
    vn = vn_sc[...]

    # h_in = h + vn[batch]  (broadcast each graph's virtual node to its nodes;
    # expressed as a tiny K=G one-hot matmul, exact).
    h_in = h + jnp.dot(pbatch_ref[...].astype(jnp.float32), vn,
                       preferred_element_type=jnp.float32)

    # --- GIN message passing --------------------------------------------
    # TODO(synk): at real OGB-ppa sizes the dense one-hot gather/scatter
    # operators (O(E*N)) must be replaced by scalar-prefetch / DMA row
    # gather + scatter-add over an edge-tile grid; kept dense at toy scale.
    edge_emb = jnp.dot(eattr_ref[...], we_ref[0],
                       preferred_element_type=jnp.float32) + be_ref[0]
    h_src = jnp.dot(gsrc_ref[...].astype(jnp.float32), h_in,
                    preferred_element_type=jnp.float32)
    msg = jnp.maximum(h_src + edge_emb, 0.0)
    agg = jnp.dot(gdstT_ref[...].astype(jnp.float32), msg,
                  preferred_element_type=jnp.float32)

    # pre = (1 + eps) * h_in + agg   (eps baked into a per-layer row vector)
    pre = eps1_ref[0] * h_in + agg

    # --- GIN MLP (BatchNorm folded into the Linear weights / biases) ------
    t = jnp.dot(pre, w1_ref[0], preferred_element_type=jnp.float32) + b1_ref[0]
    t = jnp.maximum(t, 0.0)
    t = jnp.dot(t, w2_ref[0], preferred_element_type=jnp.float32) + b2_ref[0]

    not_last = l < num_layer - 1

    @pl.when(not_last)
    def _mid_layer():
        # dropout(relu(t)) in eval mode == relu(t); JK='last', residual=False.
        h_sc[...] = jnp.maximum(t, 0.0)
        # Virtual-node update: vn = MLP(add_pool(h_in) + vn), BN folded.
        vn_tmp = jnp.dot(padd_ref[...].astype(jnp.float32), h_in,
                         preferred_element_type=jnp.float32) + vn
        z = jnp.dot(vn_tmp, wv1_ref[0],
                    preferred_element_type=jnp.float32) + bv1_ref[0]
        z = jnp.maximum(z, 0.0)
        z = jnp.dot(z, wv2_ref[0],
                    preferred_element_type=jnp.float32) + bv2_ref[0]
        vn_sc[...] = jnp.maximum(z, 0.0)

    @pl.when(jnp.logical_not(not_last))
    def _last_layer():
        # global_mean_pool + graph_pred_linear, written once at the end.
        hg = jnp.dot(pmean_ref[...], t, preferred_element_type=jnp.float32)
        out_ref[...] = jnp.dot(hg, wp_ref[...],
                               preferred_element_type=jnp.float32) + bp_ref[...]


# ----------------------------------------------------------------------------
# Wrapper: one pallas_call for the whole forward pass.
# ----------------------------------------------------------------------------
def gnn_forward(fused, h0, vn0, pbatch, padd, pmean, gsrc, gdstT, eattr):
    L = fused["w1"].shape[0]
    N, Dp = h0.shape
    G = vn0.shape[0]
    E, EDp = eattr.shape
    C = fused["wp"].shape[1]

    def const2d(shape):
        return pl.BlockSpec(shape, lambda l: (0, 0))

    def per_layer(shape):
        return pl.BlockSpec((1,) + shape, lambda l: (l, 0, 0))

    grid_spec = pltpu.PrefetchScalarGridSpec(
        num_scalar_prefetch=0,
        grid=(L,),
        in_specs=[
            const2d((N, Dp)),       # h0
            const2d((G, Dp)),       # vn0
            const2d((N, G)),        # pbatch  (bf16 one-hot)
            const2d((G, N)),        # padd    (bf16 one-hot^T)
            const2d((G, N)),        # pmean   (f32)
            const2d((E, N)),        # gsrc    (bf16 one-hot)
            const2d((N, E)),        # gdstT   (bf16 one-hot^T)
            const2d((E, EDp)),      # eattr
            per_layer((EDp, Dp)),   # we
            per_layer((1, Dp)),     # be
            per_layer((Dp, Dp)),    # w1  (BN1 folded)
            per_layer((1, Dp)),     # b1
            per_layer((Dp, Dp)),    # w2  (layer BN folded)
            per_layer((1, Dp)),     # b2
            per_layer((1, Dp)),     # eps1 = (1 + eps_l) broadcast row
            per_layer((Dp, Dp)),    # wv1 (VN BN folded; zeros for last layer)
            per_layer((1, Dp)),     # bv1
            per_layer((Dp, Dp)),    # wv2
            per_layer((1, Dp)),     # bv2
            const2d((Dp, C)),       # wp
            const2d((1, C)),        # bp
        ],
        out_specs=pl.BlockSpec((G, C), lambda l: (0, 0)),
        scratch_shapes=[pltpu.VMEM((N, Dp), jnp.float32),   # h state
                        pltpu.VMEM((G, Dp), jnp.float32)],  # vn state
    )

    flops_per_layer = 2 * (N * G * Dp + E * EDp * Dp + E * N * Dp
                           + N * E * Dp + 2 * N * Dp * Dp
                           + G * N * Dp + 2 * G * Dp * Dp)
    bytes_accessed = int(
        sum(int(x.size) * x.dtype.itemsize
            for x in (h0, vn0, pbatch, padd, pmean, gsrc, gdstT, eattr))
        + sum(int(v.size) * v.dtype.itemsize for v in fused.values())
        + G * C * 4)

    return pl.pallas_call(
        fused_gnn_kernel,
        out_shape=jax.ShapeDtypeStruct((G, C), jnp.float32),
        grid_spec=grid_spec,
        compiler_params=pltpu.CompilerParams(
            dimension_semantics=("arbitrary",)),   # layer axis carries state
        cost_estimate=pl.CostEstimate(
            flops=L * flops_per_layer, transcendentals=0,
            bytes_accessed=bytes_accessed),
    )(h0, vn0, pbatch, padd, pmean, gsrc, gdstT, eattr,
      fused["we"], fused["be"], fused["w1"], fused["b1"],
      fused["w2"], fused["b2"], fused["eps1"],
      fused["wv1"], fused["bv1"], fused["wv2"], fused["bv2"],
      fused["wp"], fused["bp"])


# ----------------------------------------------------------------------------
# Pure-JAX reference (same math, unfolded / unpadded) for correctness check.
# ----------------------------------------------------------------------------
def reference_forward(params, h0, vn0, pbatch, padd, pmean, gsrc, gdstT, eattr,
                      num_layer):
    h, vn = h0, vn0
    for l in range(num_layer):
        p = params["layers"][l]
        h_in = h + pbatch @ vn
        edge_emb = eattr @ p["we"] + p["be"]
        msg = jnp.maximum(gsrc @ h_in + edge_emb, 0.0)
        agg = gdstT @ msg
        pre = (1.0 + p["eps"][0, 0]) * h_in + agg
        t = pre @ p["w1"] + p["b1"]
        t = jnp.maximum(t * p["bn1s"] + p["bn1h"], 0.0)
        t = t @ p["w2"] + p["b2"]
        t = t * p["bnls"] + p["bnlh"]
        if l < num_layer - 1:
            t = jnp.maximum(t, 0.0)
            vp = params["vn"][l]
            vt = padd @ h_in + vn
            z = vt @ vp["w1"] + vp["b1"]
            z = jnp.maximum(z * vp["s1"] + vp["t1"], 0.0)
            z = z @ vp["w2"] + vp["b2"]
            vn = jnp.maximum(z * vp["s2"] + vp["t2"], 0.0)
        h = t
    return (pmean @ h) @ params["wp"] + params["bp"]


# ----------------------------------------------------------------------------
# Deterministic parameter construction + BN folding / padding / stacking.
# ----------------------------------------------------------------------------
def make_params(key, emb_dim, num_class, num_layer, edge_dim=7):
    def lin(k, din, dout, scale=0.1):
        kw, kb = jax.random.split(k)
        w = scale * jax.random.normal(kw, (din, dout), jnp.float32)
        b = scale * jax.random.normal(kb, (1, dout), jnp.float32)
        return w, b

    def bn(dim):
        # Freshly-initialized BatchNorm1d in eval mode:
        # gamma=1, beta=0, running_mean=0, running_var=1, eps=1e-5
        gamma = jnp.ones((1, dim), jnp.float32)
        beta = jnp.zeros((1, dim), jnp.float32)
        rm = jnp.zeros((1, dim), jnp.float32)
        rv = jnp.ones((1, dim), jnp.float32)
        scale = gamma / jnp.sqrt(rv + 1e-5)
        shift = beta - rm * scale
        return scale, shift

    keys = jax.random.split(key, 4 * num_layer + 8)
    ki = iter(keys)
    layers = []
    for _ in range(num_layer):
        we, be = lin(next(ki), edge_dim, emb_dim)
        w1, b1 = lin(next(ki), emb_dim, emb_dim)
        w2, b2 = lin(next(ki), emb_dim, emb_dim)
        bn1s, bn1h = bn(emb_dim)   # BN inside GIN mlp
        bnls, bnlh = bn(emb_dim)   # per-layer batch_norm in GNN_node
        layers.append(dict(we=we, be=be, w1=w1, b1=b1, w2=w2, b2=b2,
                           bn1s=bn1s, bn1h=bn1h, bnls=bnls, bnlh=bnlh,
                           eps=jnp.zeros((1, 1), jnp.float32)))  # GIN eps = 0
    vns = []
    for _ in range(num_layer - 1):
        w1, b1 = lin(next(ki), emb_dim, emb_dim)
        w2, b2 = lin(next(ki), emb_dim, emb_dim)
        s1, t1 = bn(emb_dim)
        s2, t2 = bn(emb_dim)
        vns.append(dict(w1=w1, b1=b1, s1=s1, t1=t1, w2=w2, b2=b2, s2=s2, t2=t2))
    wp, bp = lin(next(ki), emb_dim, num_class)
    node_emb = 0.1 * jax.random.normal(next(ki), (1, emb_dim), jnp.float32)
    return dict(layers=layers, vn=vns, wp=wp, bp=bp, node_emb=node_emb)


def fold_and_pad_params(params, pad_dim, edge_pad):
    """Fold eval-mode BN into the adjacent Linear, zero-pad to lane-friendly
    sizes, and stack per-layer tensors along a leading layer axis."""
    def pad_w(w, r, c):
        return jnp.pad(w, ((0, r - w.shape[0]), (0, c - w.shape[1])))

    we, be, w1, b1, w2, b2, eps1 = [], [], [], [], [], [], []
    for p in params["layers"]:
        we.append(pad_w(p["we"], edge_pad, pad_dim))
        be.append(pad_w(p["be"], 1, pad_dim))
        w1.append(pad_w(p["w1"] * p["bn1s"], pad_dim, pad_dim))
        b1.append(pad_w(p["b1"] * p["bn1s"] + p["bn1h"], 1, pad_dim))
        w2.append(pad_w(p["w2"] * p["bnls"], pad_dim, pad_dim))
        b2.append(pad_w(p["b2"] * p["bnls"] + p["bnlh"], 1, pad_dim))
        eps1.append((1.0 + p["eps"][0, 0]) * jnp.ones((1, pad_dim), jnp.float32))

    wv1, bv1, wv2, bv2 = [], [], [], []
    for vp in params["vn"]:
        wv1.append(pad_w(vp["w1"] * vp["s1"], pad_dim, pad_dim))
        bv1.append(pad_w(vp["b1"] * vp["s1"] + vp["t1"], 1, pad_dim))
        wv2.append(pad_w(vp["w2"] * vp["s2"], pad_dim, pad_dim))
        bv2.append(pad_w(vp["b2"] * vp["s2"] + vp["t2"], 1, pad_dim))
    # No virtual-node update after the last layer: dummy zeros, guarded by
    # pl.when inside the kernel so they are never used.
    zw = jnp.zeros((pad_dim, pad_dim), jnp.float32)
    zb = jnp.zeros((1, pad_dim), jnp.float32)
    wv1.append(zw); bv1.append(zb); wv2.append(zw); bv2.append(zb)

    return dict(
        we=jnp.stack(we), be=jnp.stack(be),
        w1=jnp.stack(w1), b1=jnp.stack(b1),
        w2=jnp.stack(w2), b2=jnp.stack(b2),
        eps1=jnp.stack(eps1),
        wv1=jnp.stack(wv1), bv1=jnp.stack(bv1),
        wv2=jnp.stack(wv2), bv2=jnp.stack(bv2),
        wp=pad_w(params["wp"], pad_dim, params["wp"].shape[1]),
        bp=params["bp"],
    )


if __name__ == "__main__":
    # Small, deterministic example consistent with the module:
    # num_layer=5, emb_dim=32 (lane-padded to 128), num_class=8,
    # 2 graphs of 8 nodes each, bidirectional ring edges.
    NUM_LAYER = 5
    EMB_DIM = 32
    PAD_DIM = 128        # lane-dense emb dim
    NUM_CLASS = 8
    EDGE_DIM = 7
    EDGE_PAD = 8         # sublane-aligned edge-feature dim
    NODES_PER_GRAPH = 8
    NUM_GRAPHS = 2
    N = NODES_PER_GRAPH * NUM_GRAPHS

    key = jax.random.PRNGKey(0)
    kparam, kedge = jax.random.split(key)
    params = make_params(kparam, EMB_DIM, NUM_CLASS, NUM_LAYER, EDGE_DIM)
    fused = fold_and_pad_params(params, PAD_DIM, EDGE_PAD)

    # Graph structure: per-graph bidirectional ring.
    src_list, dst_list, batch_list = [], [], []
    for g in range(NUM_GRAPHS):
        base = g * NODES_PER_GRAPH
        for i in range(NODES_PER_GRAPH):
            a, b = base + i, base + (i + 1) % NODES_PER_GRAPH
            src_list += [a, b]
            dst_list += [b, a]
        batch_list += [g] * NODES_PER_GRAPH
    src = jnp.array(src_list, jnp.int32)
    dst = jnp.array(dst_list, jnp.int32)
    batch = jnp.array(batch_list, jnp.int32)
    E = src.shape[0]

    edge_attr = jax.random.normal(kedge, (E, EDGE_DIM), jnp.float32)

    # Dense one-hot operators for gather / scatter-add / pooling (f32 master
    # copies for the reference; bf16 — exact for 0/1 — fed to the kernel).
    pbatch = jax.nn.one_hot(batch, NUM_GRAPHS, dtype=jnp.float32)   # [N, G]
    padd = pbatch.T                                                 # [G, N]
    counts = jnp.sum(pbatch, axis=0)
    pmean = padd / counts[:, None]                                  # [G, N]
    gsrc = jax.nn.one_hot(src, N, dtype=jnp.float32)                # [E, N]
    gdstT = jax.nn.one_hot(dst, N, dtype=jnp.float32).T             # [N, E]

    # ppa node features are all-zero indices -> every node gets embedding row 0.
    h0 = jnp.broadcast_to(params["node_emb"], (N, EMB_DIM)).astype(jnp.float32)
    # virtualnode embedding weight is initialized to zero in the reference code.
    vn0 = jnp.zeros((NUM_GRAPHS, EMB_DIM), jnp.float32)

    # Zero-padded / dtype-lowered kernel inputs.
    h0_p = jnp.pad(h0, ((0, 0), (0, PAD_DIM - EMB_DIM)))
    vn0_p = jnp.zeros((NUM_GRAPHS, PAD_DIM), jnp.float32)
    eattr_p = jnp.pad(edge_attr, ((0, 0), (0, EDGE_PAD - EDGE_DIM)))

    out = gnn_forward(fused, h0_p, vn0_p,
                      pbatch.astype(jnp.bfloat16), padd.astype(jnp.bfloat16),
                      pmean,
                      gsrc.astype(jnp.bfloat16), gdstT.astype(jnp.bfloat16),
                      eattr_p)
    out = jax.block_until_ready(out)

    ref = reference_forward(params, h0, vn0, pbatch, padd, pmean, gsrc, gdstT,
                            edge_attr, NUM_LAYER)
    assert out.shape == (NUM_GRAPHS, NUM_CLASS)
    assert jnp.allclose(out, ref, atol=1e-4, rtol=1e-4), "mismatch vs reference"

    # TODO(synk): training-mode dropout / batch-statistic BatchNorm are
    # stochastic / batch-dependent and are intentionally run in eval semantics.
    print("KERNEL_OK")
</pallas_src>

<mosaic_0001>
module attributes {stable_mosaic.version = 11 : i64} {
  func.func @fused_gnn_kernel(%arg0: i32, %arg1: memref<16x128xf32, #tpu.memory_space<vmem>>, %arg2: memref<2x128xf32, #tpu.memory_space<vmem>>, %arg3: memref<16x2xbf16, #tpu.memory_space<vmem>>, %arg4: memref<2x16xbf16, #tpu.memory_space<vmem>>, %arg5: memref<2x16xf32, #tpu.memory_space<vmem>>, %arg6: memref<32x16xbf16, #tpu.memory_space<vmem>>, %arg7: memref<16x32xbf16, #tpu.memory_space<vmem>>, %arg8: memref<32x8xf32, #tpu.memory_space<vmem>>, %arg9: memref<1x8x128xf32, #tpu.memory_space<vmem>>, %arg10: memref<1x1x128xf32, #tpu.memory_space<vmem>>, %arg11: memref<1x128x128xf32, #tpu.memory_space<vmem>>, %arg12: memref<1x1x128xf32, #tpu.memory_space<vmem>>, %arg13: memref<1x128x128xf32, #tpu.memory_space<vmem>>, %arg14: memref<1x1x128xf32, #tpu.memory_space<vmem>>, %arg15: memref<1x1x128xf32, #tpu.memory_space<vmem>>, %arg16: memref<1x128x128xf32, #tpu.memory_space<vmem>>, %arg17: memref<1x1x128xf32, #tpu.memory_space<vmem>>, %arg18: memref<1x128x128xf32, #tpu.memory_space<vmem>>, %arg19: memref<1x1x128xf32, #tpu.memory_space<vmem>>, %arg20: memref<128x8xf32, #tpu.memory_space<vmem>>, %arg21: memref<1x8xf32, #tpu.memory_space<vmem>>, %arg22: memref<2x8xf32, #tpu.memory_space<vmem>>, %arg23: memref<16x128xf32, #tpu.memory_space<vmem>>, %arg24: memref<2x128xf32, #tpu.memory_space<vmem>>) attributes {dimension_semantics = [#tpu.dimension_semantics<arbitrary>], iteration_bounds = array<i64: 5>, scalar_prefetch = 0 : i64, scratch_operands = 2 : i64, tpu.core_type = #tpu.core_type<tc>, window_params = [{pipeline_mode = #tpu.pipeline_mode<synchronous>, transform_indices = @transform_0, window_bounds = array<i64: 16, 128>}, {pipeline_mode = #tpu.pipeline_mode<synchronous>, transform_indices = @transform_1, window_bounds = array<i64: 2, 128>}, {pipeline_mode = #tpu.pipeline_mode<synchronous>, transform_indices = @transform_2, window_bounds = array<i64: 16, 2>}, {pipeline_mode = #tpu.pipeline_mode<synchronous>, transform_indices = @transform_3, window_bounds = array<i64: 2, 16>}, {pipeline_mode = #tpu.pipeline_mode<synchronous>, transform_indices = @transform_4, window_bounds = array<i64: 2, 16>}, {pipeline_mode = #tpu.pipeline_mode<synchronous>, transform_indices = @transform_5, window_bounds = array<i64: 32, 16>}, {pipeline_mode = #tpu.pipeline_mode<synchronous>, transform_indices = @transform_6, window_bounds = array<i64: 16, 32>}, {pipeline_mode = #tpu.pipeline_mode<synchronous>, transform_indices = @transform_7, window_bounds = array<i64: 32, 8>}, {transform_indices = @transform_8, window_bounds = array<i64: 1, 8, 128>}, {transform_indices = @transform_9, window_bounds = array<i64: 1, 1, 128>}, {transform_indices = @transform_10, window_bounds = array<i64: 1, 128, 128>}, {transform_indices = @transform_11, window_bounds = array<i64: 1, 1, 128>}, {transform_indices = @transform_12, window_bounds = array<i64: 1, 128, 128>}, {transform_indices = @transform_13, window_bounds = array<i64: 1, 1, 128>}, {transform_indices = @transform_14, window_bounds = array<i64: 1, 1, 128>}, {transform_indices = @transform_15, window_bounds = array<i64: 1, 128, 128>}, {transform_indices = @transform_16, window_bounds = array<i64: 1, 1, 128>}, {transform_indices = @transform_17, window_bounds = array<i64: 1, 128, 128>}, {transform_indices = @transform_18, window_bounds = array<i64: 1, 1, 128>}, {pipeline_mode = #tpu.pipeline_mode<synchronous>, transform_indices = @transform_19, window_bounds = array<i64: 128, 8>}, {pipeline_mode = #tpu.pipeline_mode<synchronous>, transform_indices = @transform_20, window_bounds = array<i64: 1, 8>}, {pipeline_mode = #tpu.pipeline_mode<synchronous>, transform_indices = @transform_21, window_bounds = array<i64: 2, 8>}]} {
    %c0_i32 = arith.constant 0 : i32
    %0 = arith.cmpi eq, %arg0, %c0_i32 : i32
    %1 = arith.extui %0 : i1 to i32
    %c0_i32_0 = arith.constant 0 : i32
    %2 = arith.cmpi ne, %1, %c0_i32_0 : i32
    scf.if %2 {
      %c0_42 = arith.constant 0 : index
      %c0_43 = arith.constant 0 : index
      %53 = vector.load %arg1[%c0_42, %c0_43] : memref<16x128xf32, #tpu.memory_space<vmem>>, vector<16x128xf32>
      %c0_44 = arith.constant 0 : index
      %c0_45 = arith.constant 0 : index
      %54 = vector.load %arg23[%c0_44, %c0_45] : memref<16x128xf32, #tpu.memory_space<vmem>>, vector<16x128xf32>
      tpu.vector_store %arg23[%c0_44, %c0_45], %53 {strides = array<i32>} : memref<16x128xf32, #tpu.memory_space<vmem>>, vector<16x128xf32>,
      %c0_46 = arith.constant 0 : index
      %c0_47 = arith.constant 0 : index
      %55 = vector.load %arg2[%c0_46, %c0_47] : memref<2x128xf32, #tpu.memory_space<vmem>>, vector<2x128xf32>
      %c0_48 = arith.constant 0 : index
      %c0_49 = arith.constant 0 : index
      %56 = vector.load %arg24[%c0_48, %c0_49] : memref<2x128xf32, #tpu.memory_space<vmem>>, vector<2x128xf32>
      tpu.vector_store %arg24[%c0_48, %c0_49], %55 {strides = array<i32>} : memref<2x128xf32, #tpu.memory_space<vmem>>, vector<2x128xf32>,
    } else {
    }
    %c0 = arith.constant 0 : index
    %c0_1 = arith.constant 0 : index
    %3 = vector.load %arg23[%c0, %c0_1] : memref<16x128xf32, #tpu.memory_space<vmem>>, vector<16x128xf32>
    %c0_2 = arith.constant 0 : index
    %c0_3 = arith.constant 0 : index
    %4 = vector.load %arg24[%c0_2, %c0_3] : memref<2x128xf32, #tpu.memory_space<vmem>>, vector<2x128xf32>
    %c0_4 = arith.constant 0 : index
    %c0_5 = arith.constant 0 : index
    %5 = vector.load %arg3[%c0_4, %c0_5] : memref<16x2xbf16, #tpu.memory_space<vmem>>, vector<16x2xbf16>
    %6 = arith.extf %5 : vector<16x2xbf16> to vector<16x2xf32>
    %cst = arith.constant dense<0.000000e+00> : vector<16x128xf32>
    %7 = tpu.matmul %6, %4, %cst {dimension_numbers = #tpu.dot_dimension_numbers<[1], [0], [0], [1], [0, 0, 1, 1], [], []>} : vector<16x2xf32>, vector<2x128xf32>, vector<16x128xf32> -> vector<16x128xf32>
    %8 = arith.addf %3, %7 : vector<16x128xf32>
    %c0_6 = arith.constant 0 : index
    %c0_7 = arith.constant 0 : index
    %9 = vector.load %arg8[%c0_6, %c0_7] : memref<32x8xf32, #tpu.memory_space<vmem>>, vector<32x8xf32>
    %c0_8 = arith.constant 0 : index
    %c0_9 = arith.constant 0 : index
    %c0_10 = arith.constant 0 : index
    %10 = vector.load %arg9[%c0_8, %c0_9, %c0_10] : memref<1x8x128xf32, #tpu.memory_space<vmem>>, vector<1x8x128xf32>
    %11 = vector.shape_cast %10 : vector<1x8x128xf32> to vector<8x128xf32>
    %cst_11 = arith.constant dense<0.000000e+00> : vector<32x128xf32>
    %12 = tpu.matmul %9, %11, %cst_11 {dimension_numbers = #tpu.dot_dimension_numbers<[1], [0], [0], [1], [0, 0, 1, 1], [], []>} : vector<32x8xf32>, vector<8x128xf32>, vector<32x128xf32> -> vector<32x128xf32>
    %c0_12 = arith.constant 0 : index
    %c0_13 = arith.constant 0 : index
    %c0_14 = arith.constant 0 : index
    %13 = vector.load %arg10[%c0_12, %c0_13, %c0_14] : memref<1x1x128xf32, #tpu.memory_space<vmem>>, vector<1x1x128xf32>
    %14 = vector.shape_cast %13 : vector<1x1x128xf32> to vector<1x128xf32>
    %15 = vector.broadcast %14 : vector<1x128xf32> to vector<32x128xf32>
    %16 = arith.addf %12, %15 : vector<32x128xf32>
    %c0_15 = arith.constant 0 : index
    %c0_16 = arith.constant 0 : index
    %17 = vector.load %arg6[%c0_15, %c0_16] : memref<32x16xbf16, #tpu.memory_space<vmem>>, vector<32x16xbf16>
    %18 = arith.extf %17 : vector<32x16xbf16> to vector<32x16xf32>
    %cst_17 = arith.constant dense<0.000000e+00> : vector<32x128xf32>
    %19 = tpu.matmul %18, %8, %cst_17 {dimension_numbers = #tpu.dot_dimension_numbers<[1], [0], [0], [1], [0, 0, 1, 1], [], []>} : vector<32x16xf32>, vector<16x128xf32>, vector<32x128xf32> -> vector<32x128xf32>
    %20 = arith.addf %19, %16 : vector<32x128xf32>
    %cst_18 = arith.constant 0.000000e+00 : f32
    %21 = vector.broadcast %cst_18 : f32 to vector<32x128xf32>
    %22 = arith.maximumf %20, %21 : vector<32x128xf32>
    %c0_19 = arith.constant 0 : index
    %c0_20 = arith.constant 0 : index
    %23 = vector.load %arg7[%c0_19, %c0_20] : memref<16x32xbf16, #tpu.memory_space<vmem>>, vector<16x32xbf16>
    %24 = arith.extf %23 : vector<16x32xbf16> to vector<16x32xf32>
    %cst_21 = arith.constant dense<0.000000e+00> : vector<16x128xf32>
    %25 = tpu.matmul %24, %22, %cst_21 {dimension_numbers = #tpu.dot_dimension_numbers<[1], [0], [0], [1], [0, 0, 1, 1], [], []>} : vector<16x32xf32>, vector<32x128xf32>, vector<16x128xf32> -> vector<16x128xf32>
    %c0_22 = arith.constant 0 : index
    %c0_23 = arith.constant 0 : index
    %c0_24 = arith.constant 0 : index
    %26 = vector.load %arg15[%c0_22, %c0_23, %c0_24] : memref<1x1x128xf32, #tpu.memory_space<vmem>>, vector<1x1x128xf32>
    %27 = vector.shape_cast %26 : vector<1x1x128xf32> to vector<1x128xf32>
    %28 = vector.broadcast %27 : vector<1x128xf32> to vector<16x128xf32>
    %29 = arith.mulf %28, %8 : vector<16x128xf32>
    %30 = arith.addf %29, %25 : vector<16x128xf32>
    %c0_25 = arith.constant 0 : index
    %c0_26 = arith.constant 0 : index
    %c0_27 = arith.constant 0 : index
    %31 = vector.load %arg11[%c0_25, %c0_26, %c0_27] : memref<1x128x128xf32, #tpu.memory_space<vmem>>, vector<1x128x128xf32>
    %32 = vector.shape_cast %31 : vector<1x128x128xf32> to vector<128x128xf32>
    %cst_28 = arith.constant dense<0.000000e+00> : vector<16x128xf32>
    %33 = tpu.matmul %30, %32, %cst_28 {dimension_numbers = #tpu.dot_dimension_numbers<[1], [0], [0], [1], [0, 0, 1, 1], [], []>} : vector<16x128xf32>, vector<128x128xf32>, vector<16x128xf32> -> vector<16x128xf32>
    %c0_29 = arith.constant 0 : index
    %c0_30 = arith.constant 0 : index
    %c0_31 = arith.constant 0 : index
    %34 = vector.load %arg12[%c0_29, %c0_30, %c0_31] : memref<1x1x128xf32, #tpu.memory_space<vmem>>, vector<1x1x128xf32>
    %35 = vector.shape_cast %34 : vector<1x1x128xf32> to vector<1x128xf32>
    %36 = vector.broadcast %35 : vector<1x128xf32> to vector<16x128xf32>
    %37 = arith.addf %33, %36 : vector<16x128xf32>
    %cst_32 = arith.constant 0.000000e+00 : f32
    %38 = vector.broadcast %cst_32 : f32 to vector<16x128xf32>
    %39 = arith.maximumf %37, %38 : vector<16x128xf32>
    %c0_33 = arith.constant 0 : index
    %c0_34 = arith.constant 0 : index
    %c0_35 = arith.constant 0 : index
    %40 = vector.load %arg13[%c0_33, %c0_34, %c0_35] : memref<1x128x128xf32, #tpu.memory_space<vmem>>, vector<1x128x128xf32>
    %41 = vector.shape_cast %40 : vector<1x128x128xf32> to vector<128x128xf32>
    %cst_36 = arith.constant dense<0.000000e+00> : vector<16x128xf32>
    %42 = tpu.matmul %39, %41, %cst_36 {dimension_numbers = #tpu.dot_dimension_numbers<[1], [0], [0], [1], [0, 0, 1, 1], [], []>} : vector<16x128xf32>, vector<128x128xf32>, vector<16x128xf32> -> vector<16x128xf32>
    %c0_37 = arith.constant 0 : index
    %c0_38 = arith.constant 0 : index
    %c0_39 = arith.constant 0 : index
    %43 = vector.load %arg14[%c0_37, %c0_38, %c0_39] : memref<1x1x128xf32, #tpu.memory_space<vmem>>, vector<1x1x128xf32>
    %44 = vector.shape_cast %43 : vector<1x1x128xf32> to vector<1x128xf32>
    %45 = vector.broadcast %44 : vector<1x128xf32> to vector<16x128xf32>
    %46 = arith.addf %42, %45 : vector<16x128xf32>
    %c4_i32 = arith.constant 4 : i32
    %47 = arith.cmpi slt, %arg0, %c4_i32 : i32
    %48 = arith.extui %47 : i1 to i32
    %c0_i32_40 = arith.constant 0 : i32
    %49 = arith.cmpi ne, %48, %c0_i32_40 : i32
    scf.if %49 {
      %cst_42 = arith.constant 0.000000e+00 : f32
      %53 = vector.broadcast %cst_42 : f32 to vector<16x128xf32>
      %54 = arith.maximumf %46, %53 : vector<16x128xf32>
      %c0_43 = arith.constant 0 : index
      %c0_44 = arith.constant 0 : index
      %55 = vector.load %arg23[%c0_43, %c0_44] : memref<16x128xf32, #tpu.memory_space<vmem>>, vector<16x128xf32>
      tpu.vector_store %arg23[%c0_43, %c0_44], %54 {strides = array<i32>} : memref<16x128xf32, #tpu.memory_space<vmem>>, vector<16x128xf32>,
      %c0_45 = arith.constant 0 : index
      %c0_46 = arith.constant 0 : index
      %56 = vector.load %arg4[%c0_45, %c0_46] : memref<2x16xbf16, #tpu.memory_space<vmem>>, vector<2x16xbf16>
      %57 = arith.extf %56 : vector<2x16xbf16> to vector<2x16xf32>
      %cst_47 = arith.constant dense<0.000000e+00> : vector<2x128xf32>
      %58 = tpu.matmul %57, %8, %cst_47 {dimension_numbers = #tpu.dot_dimension_numbers<[1], [0], [0], [1], [0, 0, 1, 1], [], []>} : vector<2x16xf32>, vector<16x128xf32>, vector<2x128xf32> -> vector<2x128xf32>
      %59 = arith.addf %58, %4 : vector<2x128xf32>
      %c0_48 = arith.constant 0 : index
      %c0_49 = arith.constant 0 : index
      %c0_50 = arith.constant 0 : index
      %60 = vector.load %arg16[%c0_48, %c0_49, %c0_50] : memref<1x128x128xf32, #tpu.memory_space<vmem>>, vector<1x128x128xf32>
      %61 = vector.shape_cast %60 : vector<1x128x128xf32> to vector<128x128xf32>
      %cst_51 = arith.constant dense<0.000000e+00> : vector<2x128xf32>
      %62 = tpu.matmul %59, %61, %cst_51 {dimension_numbers = #tpu.dot_dimension_numbers<[1], [0], [0], [1], [0, 0, 1, 1], [], []>} : vector<2x128xf32>, vector<128x128xf32>, vector<2x128xf32> -> vector<2x128xf32>
      %c0_52 = arith.constant 0 : index
      %c0_53 = arith.constant 0 : index
      %c0_54 = arith.constant 0 : index
      %63 = vector.load %arg17[%c0_52, %c0_53, %c0_54] : memref<1x1x128xf32, #tpu.memory_space<vmem>>, vector<1x1x128xf32>
      %64 = vector.shape_cast %63 : vector<1x1x128xf32> to vector<1x128xf32>
      %65 = vector.broadcast %64 : vector<1x128xf32> to vector<2x128xf32>
      %66 = arith.addf %62, %65 : vector<2x128xf32>
      %cst_55 = arith.constant 0.000000e+00 : f32
      %67 = vector.broadcast %cst_55 : f32 to vector<2x128xf32>
      %68 = arith.maximumf %66, %67 : vector<2x128xf32>
      %c0_56 = arith.constant 0 : index
      %c0_57 = arith.constant 0 : index
      %c0_58 = arith.constant 0 : index
      %69 = vector.load %arg18[%c0_56, %c0_57, %c0_58] : memref<1x128x128xf32, #tpu.memory_space<vmem>>, vector<1x128x128xf32>
      %70 = vector.shape_cast %69 : vector<1x128x128xf32> to vector<128x128xf32>
      %cst_59 = arith.constant dense<0.000000e+00> : vector<2x128xf32>
      %71 = tpu.matmul %68, %70, %cst_59 {dimension_numbers = #tpu.dot_dimension_numbers<[1], [0], [0], [1], [0, 0, 1, 1], [], []>} : vector<2x128xf32>, vector<128x128xf32>, vector<2x128xf32> -> vector<2x128xf32>
      %c0_60 = arith.constant 0 : index
      %c0_61 = arith.constant 0 : index
      %c0_62 = arith.constant 0 : index
      %72 = vector.load %arg19[%c0_60, %c0_61, %c0_62] : memref<1x1x128xf32, #tpu.memory_space<vmem>>, vector<1x1x128xf32>
      %73 = vector.shape_cast %72 : vector<1x1x128xf32> to vector<1x128xf32>
      %74 = vector.broadcast %73 : vector<1x128xf32> to vector<2x128xf32>
      %75 = arith.addf %71, %74 : vector<2x128xf32>
      %cst_63 = arith.constant 0.000000e+00 : f32
      %76 = vector.broadcast %cst_63 : f32 to vector<2x128xf32>
      %77 = arith.maximumf %75, %76 : vector<2x128xf32>
      %c0_64 = arith.constant 0 : index
      %c0_65 = arith.constant 0 : index
      %78 = vector.load %arg24[%c0_64, %c0_65] : memref<2x128xf32, #tpu.memory_space<vmem>>, vector<2x128xf32>
      tpu.vector_store %arg24[%c0_64, %c0_65], %77 {strides = array<i32>} : memref<2x128xf32, #tpu.memory_space<vmem>>, vector<2x128xf32>,
    } else {
    }
    %true = arith.constant true
    %50 = arith.xori %47, %true : i1
    %51 = arith.extui %50 : i1 to i32
    %c0_i32_41 = arith.constant 0 : i32
    %52 = arith.cmpi ne, %51, %c0_i32_41 : i32
    scf.if %52 {
      %c0_42 = arith.constant 0 : index
      %c0_43 = arith.constant 0 : index
      %53 = vector.load %arg5[%c0_42, %c0_43] : memref<2x16xf32, #tpu.memory_space<vmem>>, vector<2x16xf32>
      %cst_44 = arith.constant dense<0.000000e+00> : vector<2x128xf32>
      %54 = tpu.matmul %53, %46, %cst_44 {dimension_numbers = #tpu.dot_dimension_numbers<[1], [0], [0], [1], [0, 0, 1, 1], [], []>} : vector<2x16xf32>, vector<16x128xf32>, vector<2x128xf32> -> vector<2x128xf32>
      %c0_45 = arith.constant 0 : index
      %c0_46 = arith.constant 0 : index
      %55 = vector.load %arg20[%c0_45, %c0_46] : memref<128x8xf32, #tpu.memory_space<vmem>>, vector<128x8xf32>
      %cst_47 = arith.constant dense<0.000000e+00> : vector<2x8xf32>
      %56 = tpu.matmul %54, %55, %cst_47 {dimension_numbers = #tpu.dot_dimension_numbers<[1], [0], [0], [1], [0, 0, 1, 1], [], []>} : vector<2x128xf32>, vector<128x8xf32>, vector<2x8xf32> -> vector<2x8xf32>
      %c0_48 = arith.constant 0 : index
      %c0_49 = arith.constant 0 : index
      %57 = vector.load %arg21[%c0_48, %c0_49] : memref<1x8xf32, #tpu.memory_space<vmem>>, vector<1x8xf32>
      %58 = vector.broadcast %57 : vector<1x8xf32> to vector<2x8xf32>
      %59 = arith.addf %56, %58 : vector<2x8xf32>
      %c0_50 = arith.constant 0 : index
      %c0_51 = arith.constant 0 : index
      %60 = vector.load %arg22[%c0_50, %c0_51] : memref<2x8xf32, #tpu.memory_space<vmem>>, vector<2x8xf32>
      tpu.vector_store %arg22[%c0_50, %c0_51], %59 {strides = array<i32>} : memref<2x8xf32, #tpu.memory_space<vmem>>, vector<2x8xf32>,
    } else {
    }
    return
  }
  func.func @transform_0(%arg0: i32) -> (i32, i32) {
    %c0_i32 = arith.constant 0 : i32
    %c0_i32_0 = arith.constant 0 : i32
    %c0_i32_1 = arith.constant 0 : i32
    return %c0_i32, %c0_i32_0 : i32, i32
  }
  func.func @transform_1(%arg0: i32) -> (i32, i32) {
    %c0_i32 = arith.constant 0 : i32
    %c0_i32_0 = arith.constant 0 : i32
    %c0_i32_1 = arith.constant 0 : i32
    return %c0_i32, %c0_i32_0 : i32, i32
  }
  func.func @transform_2(%arg0: i32) -> (i32, i32) {
    %c0_i32 = arith.constant 0 : i32
    %c0_i32_0 = arith.constant 0 : i32
    %c0_i32_1 = arith.constant 0 : i32
    return %c0_i32, %c0_i32_0 : i32, i32
  }
  func.func @transform_3(%arg0: i32) -> (i32, i32) {
    %c0_i32 = arith.constant 0 : i32
    %c0_i32_0 = arith.constant 0 : i32
    %c0_i32_1 = arith.constant 0 : i32
    return %c0_i32, %c0_i32_0 : i32, i32
  }
  func.func @transform_4(%arg0: i32) -> (i32, i32) {
    %c0_i32 = arith.constant 0 : i32
    %c0_i32_0 = arith.constant 0 : i32
    %c0_i32_1 = arith.constant 0 : i32
    return %c0_i32, %c0_i32_0 : i32, i32
  }
  func.func @transform_5(%arg0: i32) -> (i32, i32) {
    %c0_i32 = arith.constant 0 : i32
    %c0_i32_0 = arith.constant 0 : i32
    %c0_i32_1 = arith.constant 0 : i32
    return %c0_i32, %c0_i32_0 : i32, i32
  }
  func.func @transform_6(%arg0: i32) -> (i32, i32) {
    %c0_i32 = arith.constant 0 : i32
    %c0_i32_0 = arith.constant 0 : i32
    %c0_i32_1 = arith.constant 0 : i32
    return %c0_i32, %c0_i32_0 : i32, i32
  }
  func.func @transform_7(%arg0: i32) -> (i32, i32) {
    %c0_i32 = arith.constant 0 : i32
    %c0_i32_0 = arith.constant 0 : i32
    %c0_i32_1 = arith.constant 0 : i32
    return %c0_i32, %c0_i32_0 : i32, i32
  }
  func.func @transform_8(%arg0: i32) -> (i32, i32, i32) {
    %c0_i32 = arith.constant 0 : i32
    %c0_i32_0 = arith.constant 0 : i32
    %c0_i32_1 = arith.constant 0 : i32
    return %arg0, %c0_i32, %c0_i32_0 : i32, i32, i32
  }
  func.func @transform_9(%arg0: i32) -> (i32, i32, i32) {
    %c0_i32 = arith.constant 0 : i32
    %c0_i32_0 = arith.constant 0 : i32
    %c0_i32_1 = arith.constant 0 : i32
    return %arg0, %c0_i32, %c0_i32_0 : i32, i32, i32
  }
  func.func @transform_10(%arg0: i32) -> (i32, i32, i32) {
    %c0_i32 = arith.constant 0 : i32
    %c0_i32_0 = arith.constant 0 : i32
    %c0_i32_1 = arith.constant 0 : i32
    return %arg0, %c0_i32, %c0_i32_0 : i32, i32, i32
  }
  func.func @transform_11(%arg0: i32) -> (i32, i32, i32) {
    %c0_i32 = arith.constant 0 : i32
    %c0_i32_0 = arith.constant 0 : i32
    %c0_i32_1 = arith.constant 0 : i32
    return %arg0, %c0_i32, %c0_i32_0 : i32, i32, i32
  }
  func.func @transform_12(%arg0: i32) -> (i32, i32, i32) {
    %c0_i32 = arith.constant 0 : i32
    %c0_i32_0 = arith.constant 0 : i32
    %c0_i32_1 = arith.constant 0 : i32
    return %arg0, %c0_i32, %c0_i32_0 : i32, i32, i32
  }
  func.func @transform_13(%arg0: i32) -> (i32, i32, i32) {
    %c0_i32 = arith.constant 0 : i32
    %c0_i32_0 = arith.constant 0 : i32
    %c0_i32_1 = arith.constant 0 : i32
    return %arg0, %c0_i32, %c0_i32_0 : i32, i32, i32
  }
  func.func @transform_14(%arg0: i32) -> (i32, i32, i32) {
    %c0_i32 = arith.constant 0 : i32
    %c0_i32_0 = arith.constant 0 : i32
    %c0_i32_1 = arith.constant 0 : i32
    return %arg0, %c0_i32, %c0_i32_0 : i32, i32, i32
  }
  func.func @transform_15(%arg0: i32) -> (i32, i32, i32) {
    %c0_i32 = arith.constant 0 : i32
    %c0_i32_0 = arith.constant 0 : i32
    %c0_i32_1 = arith.constant 0 : i32
    return %arg0, %c0_i32, %c0_i32_0 : i32, i32, i32
  }
  func.func @transform_16(%arg0: i32) -> (i32, i32, i32) {
    %c0_i32 = arith.constant 0 : i32
    %c0_i32_0 = arith.constant 0 : i32
    %c0_i32_1 = arith.constant 0 : i32
    return %arg0, %c0_i32, %c0_i32_0 : i32, i32, i32
  }
  func.func @transform_17(%arg0: i32) -> (i32, i32, i32) {
    %c0_i32 = arith.constant 0 : i32
    %c0_i32_0 = arith.constant 0 : i32
    %c0_i32_1 = arith.constant 0 : i32
    return %arg0, %c0_i32, %c0_i32_0 : i32, i32, i32
  }
  func.func @transform_18(%arg0: i32) -> (i32, i32, i32) {
    %c0_i32 = arith.constant 0 : i32
    %c0_i32_0 = arith.constant 0 : i32
    %c0_i32_1 = arith.constant 0 : i32
    return %arg0, %c0_i32, %c0_i32_0 : i32, i32, i32
  }
  func.func @transform_19(%arg0: i32) -> (i32, i32) {
    %c0_i32 = arith.constant 0 : i32
    %c0_i32_0 = arith.constant 0 : i32
    %c0_i32_1 = arith.constant 0 : i32
    return %c0_i32, %c0_i32_0 : i32, i32
  }
  func.func @transform_20(%arg0: i32) -> (i32, i32) {
    %c0_i32 = arith.constant 0 : i32
    %c0_i32_0 = arith.constant 0 : i32
    %c0_i32_1 = arith.constant 0 : i32
    return %c0_i32, %c0_i32_0 : i32, i32
  }
  func.func @transform_21(%arg0: i32) -> (i32, i32) {
    %c0_i32 = arith.constant 0 : i32
    %c0_i32_0 = arith.constant 0 : i32
    %c0_i32_1 = arith.constant 0 : i32
    return %c0_i32, %c0_i32_0 : i32, i32
  }
}

</mosaic_0001>

<bundles_post_ra>
// kernel: tpu_custom_call.1
= control target key start
LH: loop header
LB: loop body
LE: loop exit
PB: predicated region body
PF: predicated region fallthrough
CT: control target
= control target key end

     0   :  { %s3460_s0 = inlined_call_operand.vmem [shape: f32[16,128], index: 0, kind: input, shape index: {}]   ;;  %s3461_s1 = inlined_call_operand.vmem [shape: f32[2,128], index: 1, kind: input, shape index: {}]   ;;  %s3462_s2 = inlined_call_operand.vmem [shape: bf16[16,2], index: 2, kind: input, shape index: {}]   ;;  %s3463_s3 = inlined_call_operand.vmem [shape: bf16[2,16], index: 3, kind: input, shape index: {}]   ;;  %s3464_s4 = inlined_call_operand.vmem [shape: f32[2,16], index: 4, kind: input, shape index: {}]   ;;  %s3465_s5 = inlined_call_operand.vmem [shape: bf16[32,16], index: 5, kind: input, shape index: {}]   ;;  %s3466_s6 = inlined_call_operand.vmem [shape: bf16[16,32], index: 6, kind: input, shape index: {}]   ;;  %s3467_s7 = inlined_call_operand.vmem [shape: f32[32,8], index: 7, kind: input, shape index: {}]   ;;  %s3468_s8 = inlined_call_operand.vmem [shape: f32[5,8,128], index: 8, kind: input, shape index: {}]   ;;  %s3469_s9 = inlined_call_operand.vmem [shape: f32[5,1,128], index: 9, kind: input, shape index: {}]   ;;  %s3470_s10 = inlined_call_operand.hbm [shape: f32[5,128,128], index: 10, kind: input, shape index: {}]   ;;  %s3471_s11 = inlined_call_operand.vmem [shape: f32[5,1,128], index: 11, kind: input, shape index: {}]   ;;  %s3472_s12 = inlined_call_operand.hbm [shape: f32[5,128,128], index: 12, kind: input, shape index: {}]   ;;  %s3473_s13 = inlined_call_operand.vmem [shape: f32[5,1,128], index: 13, kind: input, shape index: {}]   ;;  %s3474_s14 = inlined_call_operand.vmem [shape: f32[5,1,128], index: 14, kind: input, shape index: {}]   ;;  %s3475_s15 = inlined_call_operand.hbm [shape: f32[5,128,128], index: 15, kind: input, shape index: {}]   ;;  %s3476_s16 = inlined_call_operand.vmem [shape: f32[5,1,128], index: 16, kind: input, shape index: {}]   ;;  %s3477_s17 = inlined_call_operand.hbm [shape: f32[5,128,128], index: 17, kind: input, shape index: {}]   ;;  %s3478_s18 = inlined_call_operand.vmem [shape: f32[5,1,128], index: 18, kind: input, shape index: {}]   ;;  %s3479_s19 = inlined_call_operand.vmem [shape: f32[128,8], index: 19, kind: input, shape index: {}]   ;;  %s3480_s20 = inlined_call_operand.vmem [shape: f32[1,8], index: 20, kind: input, shape index: {}]   ;;  %s3481_s21 = inlined_call_operand.hbm [shape: f32[2,8], index: 21, kind: output, shape index: {}]  }
   0x1   :  { %3494 = sst [smem:[#allocation20_spill]] %s3460_s0 }
   0x2   :  { %3495 = sst [smem:[#allocation21_spill]] %s3461_s1 }
   0x3   :  { %3496 = sst [smem:[#allocation22_spill]] %s3462_s2 }
   0x4   :  { %3497 = sst [smem:[#allocation23_spill]] %s3463_s3 }
   0x5   :  { %3498 = sst [smem:[#allocation24_spill]] %s3464_s4 }
   0x6   :  { %3499 = sst [smem:[#allocation25_spill]] %s3465_s5 }
   0x7   :  { %3500 = sst [smem:[#allocation26_spill]] %s3466_s6 }
   0x8   :  { %3501 = sst [smem:[#allocation27_spill]] %s3467_s7 }
   0x9   :  { %3502 = sst [smem:[#allocation28_spill]] %s3470_s10 }
   0xa   :  { %3503 = sst [smem:[#allocation29_spill]] %s3472_s12 }
   0xb   :  { %3504 = sst [smem:[#allocation30_spill]] %s3475_s15 }
   0xc   :  { %3505 = sst [smem:[#allocation31_spill]] %s3476_s16 }
   0xd   :  { %3506 = sst [smem:[#allocation32_spill]] %s3477_s17 }
   0xe   :  { %3507 = sst [smem:[#allocation33_spill]] %s3478_s18 }
   0xf   :  { %3508 = sst [smem:[#allocation34_spill]] %s3479_s19 }
  0x10   :  { %3509 = sst [smem:[#allocation35_spill]] %s3480_s20 }
  0x11   :  { %3510 = sst [smem:[#allocation36_spill]] %s3481_s21 }
  0x12   :  { %26 = vsyncpa [#allocation5], 0 }
  0x13   :  { %28 = vsyncpa [#allocation5 + $0x1], 0 }
  0x14   :  { %29 = vsyncpa [#allocation8], 0 }
  0x15   :  { %31 = vsyncpa [#allocation8 + $0x1], 0 }
  0x16   :  { %32 = vsyncpa [#allocation11], 0 }
  0x17   :  { %34 = vsyncpa [#allocation11 + $0x1], 0 }
  0x18   :  { %35 = vsyncpa [#allocation6], 0  ;;  %s2914_s2 = smov 0   ;;  %s2916_s25 = smov 0  }
  0x19   :  { %s2918_s26 = smov 0   ;;  %s2920_s27 = smov 0  }
  0x1a LB: > { %3511 = sst [smem:[#allocation17_spill]] %s2787_s26  ;;  %s2933_s3 = sadd.s32 4294967295, %s2791_s27   ;;  %s2791_s27 = sphi %s2920_s27, %s3545_s27   ;;  %s2787_s26 = sphi %s2918_s26, %s3547_s26   ;;  %s2783_s25 = sphi %s2916_s25, %s3549_s25   ;;  %s2779_s2 = sphi %s2914_s2, %s3548_s2  }
  0x1b   : > { %s2936_s28 = sadd.s32 1, %s2791_s27   ;;  %s268_s0 = sadd.s32 1, %s2787_s26 }
  0x1c   : > { %3512 = sst [smem:[#allocation18_spill]] %s2936_s28  ;;  %s265_s29 = ssub.s32 %s2791_s27, %s2936_s28 }
  0x1d   : > { %p266_p0 = scmp.eq.s32.totalorder %s265_s29, 0  ;;  %p275_p1 = scmp.ne.s32.totalorder %s2787_s26, %s2783_s25 }
  0x1e   : > { %p276_p2 = scmp.eq.s32.totalorder %s2791_s27, 0  ;;  %p281_p3 = scmp.ne.s32.totalorder %s2783_s25, %s2779_s2 }
  0x1f   : > { %s2946_s4 = scalar_select %p266_p0, %s2787_s26, %s268_s0  }
  0x20   : > { %p277_p4 = por %p276_p2, %p275_p1  ;;  %p282_p5 = scmp.eq.s32.totalorder %s2933_s3, 0 }
  0x21   : > { %3513 = sst [smem:[#allocation19_spill]] %s2946_s4  ;;  %p2567_p6 = scmp.lt.s32.totalorder %s2791_s27, 5 }
  0x22   : > { %p2950_p7 = por %p282_p5, %p281_p3  ;;  %s2955_s5 = sand.u32 1, %s2787_s26  }
  0x23   : > { %s2958_s22 = sshll.u32 %s2955_s5, 7  ;;  %s2961_s23 = sshll.u32 %s2791_s27, 11 }
  0x24   : > { %s3514_s30 = scalar_select %p2950_p7, 1, 0 }
  0x25   : > { %p2963_p8 = pnand %p2567_p6, %p277_p4  ;;  %s646_s24 = sand.u32 1, %s2791_s27  }
  0x26   : > { %s3516_s12 = sld [smem:[#allocation29_spill]]  ;;  %s650_s4 = scalar_lea.vmem [#allocation7], %s2958_s22 }
  0x27   : > { %s657_s26 = sshll.u32 %s650_s4, 4  ;;  %s2979_s28 = scalar_lea.sflag [#allocation8], %s646_s24  ;;  %s2976_s26 = int_to_ptr.vmem [resolvable:$true] %s657_s26 }
  0x28   : > { %p2985_p12 = pneg %p2963_p8 }
  0x2c   : > { %s2972_s0 = scalar_lea.hbm %s3516_s12, %s2961_s23  ;;  %s2614_s4 = scalar_lea.hbm %s3516_s12, 10240 }
  0x2d   : > { %s2609_s21 = scalar_lea.hbm %s2972_s0, 2048  ;;  %p2615_p1 = scmp.lt.s32.totalorder %s2972_s0, %s3516_s12 }
  0x2e   : > { %p2610_p11 = scmp.ne.s32.totalorder %s2972_s0, %s2609_s21  ;;  %p2616_p2 = scmp.lt.s32.totalorder %s2614_s4, %s2609_s21 }
  0x30   : > { %p2612_p13 = pnand %p2985_p12, %p2610_p11  ;;  %p2617_p3 = por %p2616_p2, %p2615_p1 }
  0x32   : > { %p2613_p0 = pneg %p2612_p13 }
  0x34   : > { %p2618_p4 = pnand %p2617_p3, %p2613_p0 }
  0x36   : > { %2621 = shalt.err (!%p2618_p4)
}
  0x37   : > { %s2622_s24 = scalar_lea.vmem %s2976_s26, 2048  ;;  %s2793_s7 = smov [#allocation7]  }
  0x38   : > { %p2623_p5 = scmp.ne.s32.totalorder %s2976_s26, %s2622_s24  ;;  %s2627_s2 = sshll.u32 %s2793_s7, 4  ;;  %s2628_s2 = int_to_ptr.vmem [resolvable:$false] %s2627_s2 }
  0x39   : > { %s2629_s29 = scalar_lea.vmem %s2628_s2, 4096  ;;  %p2630_p13 = scmp.lt.s32.totalorder %s2976_s26, %s2628_s2 }
  0x3a   : > { %p2625_p6 = pnand %p2623_p5, %p2985_p12  ;;  %p2631_p9 = scmp.lt.s32.totalorder %s2629_s29, %s2622_s24 }
  0x3c   : > { %p2626_p11 = pneg %p2625_p6  ;;  %p2632_p10 = por %p2631_p9, %p2630_p13 }
  0x3e   : > { %p2633_p7 = pnand %p2632_p10, %p2626_p11 }
  0x40   : > { %2636 = shalt.err (!%p2633_p7)
}
  0x41   : > { %s3490_s6 = smov 128   ;;  %s3492_s7 = smov 8  }
  0x42   : > { %2560 = dma.hbm_to_vmem [thread:$0]  (!%p2963_p8), %s2972_s0, 2048, %s2976_s26, %s2979_s28, %s3490_s6, %s3490_s6, %s3492_s7  }
  0x43   : > { %p3518_p9 = scmp.lt.s32.totalorder %s2791_s27, 6  ;;  %p3519_p7 = scmp.ge.s32.totalorder %s2791_s27, 1 }
  0x44   : > { %s3521_s10 = sld [smem:[#allocation28_spill]]  ;;  %s623_s2 = scalar_lea.vmem [#allocation4], %s2958_s22 }
  0x45   : > { %p3015_p10 = pnand %p3519_p7, %p3518_p9  ;;  %s630_s29 = sshll.u32 %s623_s2, 4  ;;  %s3026_s29 = int_to_ptr.vmem [resolvable:$true] %s630_s29 }
  0x46   : > { %s3522_s15 = sld [smem:[#allocation30_spill]]  ;;  %s620_s0 = scalar_lea.sflag [#allocation5], %s2955_s5 }
  0x47   : > { %s3520_s19 = scalar_select %p3015_p10, 1, 0 }
  0x4a   : > { %s3023_s24 = scalar_lea.hbm %s3521_s10, %s2961_s23  ;;  %s2642_s7 = scalar_lea.hbm %s3521_s10, 10240 }
  0x4b   : > { %s2637_s6 = scalar_lea.hbm %s3023_s24, 2048  ;;  %p2643_p3 = scmp.lt.s32.totalorder %s3023_s24, %s3521_s10 }
  0x4c   : > { %s3032_s27 = scalar_lea.hbm %s3522_s15, %s2961_s23  ;;  %p2638_p0 = scmp.ne.s32.totalorder %s3023_s24, %s2637_s6 }
  0x4d   : > { %p2644_p4 = scmp.lt.s32.totalorder %s2642_s7, %s2637_s6 }
  0x4e   : > { %p2640_p1 = pnand %p2638_p0, %p2985_p12 }
  0x4f   : > { %p2645_p5 = por %p2644_p4, %p2643_p3 }
  0x50   : > { %p2641_p2 = pneg %p2640_p1 }
  0x52   : > { %p2646_p6 = pnand %p2645_p5, %p2641_p2 }
  0x54   : > { %2649 = shalt.err (!%p2646_p6)
}
  0x55   : > { %s2650_s12 = scalar_lea.vmem %s3026_s29, 2048  ;;  %s2796_s2 = smov [#allocation4]  }
  0x56   : > { %p2651_p11 = scmp.ne.s32.totalorder %s3026_s29, %s2650_s12  ;;  %s2655_s26 = sshll.u32 %s2796_s2, 4  ;;  %s2656_s26 = int_to_ptr.vmem [resolvable:$false] %s2655_s26 }
  0x57   : > { %s2657_s21 = scalar_lea.vmem %s2656_s26, 4096  ;;  %p2658_p7 = scmp.lt.s32.totalorder %s3026_s29, %s2656_s26 }
  0x58   : > { %p2653_p13 = pnand %p2651_p11, %p2985_p12  ;;  %p2659_p0 = scmp.lt.s32.totalorder %s2657_s21, %s2650_s12 }
  0x5a   : > { %p2654_p9 = pneg %p2653_p13  ;;  %p2660_p1 = por %p2659_p0, %p2658_p7 }
  0x5c   : > { %p2661_p10 = pnand %p2660_p1, %p2654_p9 }
  0x5e   : > { %2664 = shalt.err (!%p2661_p10)
}
  0x5f   : > { %s3523_s16 = smov 8   ;;  %s3524_s18 = smov 128  }
  0x60   : > { %2557 = dma.hbm_to_vmem [thread:$0]  (!%p2963_p8), %s3023_s24, 2048, %s3026_s29, %s620_s0, %s3524_s18, %s3524_s18, %s3523_s16  }
  0x61   : > { %s683_s6 = scalar_lea.vmem [#allocation9], %s2958_s22  ;;  %s2665_s4 = scalar_lea.hbm %s3032_s27, 2048 }
  0x62   : > { %s690_s7 = sshll.u32 %s683_s6, 4  ;;  %p2666_p2 = scmp.ne.s32.totalorder %s3032_s27, %s2665_s4  ;;  %s691_s7 = int_to_ptr.vmem [resolvable:$true] %s690_s7 }
  0x63   : > { %s2670_s26 = scalar_lea.hbm %s3522_s15, 10240  ;;  %p2671_p4 = scmp.lt.s32.totalorder %s3032_s27, %s3522_s15 }
  0x64   : > { %p2668_p10 = pnand %p2666_p2, %p2985_p12  ;;  %p2672_p5 = scmp.lt.s32.totalorder %s2670_s26, %s2665_s4 }
  0x66   : > { %p2669_p3 = pneg %p2668_p10  ;;  %p2673_p6 = por %p2672_p5, %p2671_p4 }
  0x68   : > { %p2674_p11 = pnand %p2673_p6, %p2669_p3 }
  0x6a   : > { %2677 = shalt.err (!%p2674_p11)
}
  0x6b   : > { %s2678_s24 = scalar_lea.vmem %s691_s7, 2048  ;;  %s2797_s29 = smov [#allocation9]  }
  0x6c   : > { %p2679_p13 = scmp.ne.s32.totalorder %s691_s7, %s2678_s24  ;;  %s2683_s0 = sshll.u32 %s2797_s29, 4  ;;  %s2684_s0 = int_to_ptr.vmem [resolvable:$false] %s2683_s0 }
  0x6d   : > { %s2685_s6 = scalar_lea.vmem %s2684_s0, 4096  ;;  %p2686_p0 = scmp.lt.s32.totalorder %s691_s7, %s2684_s0 }
  0x6e   : > { %p2681_p9 = pnand %p2679_p13, %p2985_p12  ;;  %p2687_p1 = scmp.lt.s32.totalorder %s2685_s6, %s2678_s24 }
  0x70   : > { %p2682_p7 = pneg %p2681_p9  ;;  %p2688_p2 = por %p2687_p1, %p2686_p0 }
  0x72   : > { %p2689_p10 = pnand %p2688_p2, %p2682_p7 }
  0x74   : > { %2692 = shalt.err (!%p2689_p10)
}
  0x75   : > { %2563 = dma.hbm_to_vmem [thread:$0]  (!%p2963_p8), %s3032_s27, 2048, %s691_s7, %s2979_s28, %s3524_s18, %s3524_s18, %s3523_s16  }
  0x76   : > { %s3525_s17 = sld [smem:[#allocation32_spill]]  ;;  %s710_s2 = scalar_lea.vmem [#allocation10], %s2958_s22 }
  0x77   : > { %s717_s26 = sshll.u32 %s710_s2, 4  ;;  %s707_s21 = scalar_lea.sflag [#allocation11], %s2955_s5  ;;  %s3086_s26 = int_to_ptr.vmem [resolvable:$true] %s717_s26 }
  0x7c   : > { %s3083_s12 = scalar_lea.hbm %s3525_s17, %s2961_s23  ;;  %s2698_s27 = scalar_lea.hbm %s3525_s17, 10240 }
  0x7d   : > { %s2693_s24 = scalar_lea.hbm %s3083_s12, 2048  ;;  %p2699_p6 = scmp.lt.s32.totalorder %s3083_s12, %s3525_s17 }
  0x7e   : > { %p2694_p3 = scmp.ne.s32.totalorder %s3083_s12, %s2693_s24  ;;  %p2700_p11 = scmp.lt.s32.totalorder %s2698_s27, %s2693_s24 }
  0x80   : > { %p2696_p4 = pnand %p2694_p3, %p2985_p12  ;;  %p2701_p13 = por %p2700_p11, %p2699_p6 }
  0x82   : > { %p2697_p5 = pneg %p2696_p4 }
  0x84   : > { %p2702_p9 = pnand %p2701_p13, %p2697_p5 }
  0x86   : > { %2705 = shalt.err (!%p2702_p9)
}
  0x87   : > { %s2706_s5 = scalar_lea.vmem %s3086_s26, 2048  ;;  %s2798_s22 = smov [#allocation10]  }
  0x88   : > { %p2707_p7 = scmp.ne.s32.totalorder %s3086_s26, %s2706_s5  ;;  %s2711_s0 = sshll.u32 %s2798_s22, 4  ;;  %s2712_s0 = int_to_ptr.vmem [resolvable:$false] %s2711_s0 }
  0x89   : > { %s2713_s6 = scalar_lea.vmem %s2712_s0, 4096  ;;  %p2714_p2 = scmp.lt.s32.totalorder %s3086_s26, %s2712_s0 }
  0x8a   : > { %p2709_p0 = pnand %p2707_p7, %p2985_p12  ;;  %p2715_p10 = scmp.lt.s32.totalorder %s2713_s6, %s2706_s5 }
  0x8c   : > { %p2710_p1 = pneg %p2709_p0  ;;  %p2716_p3 = por %p2715_p10, %p2714_p2 }
  0x8e   : > { %p2717_p4 = pnand %p2716_p3, %p2710_p1 }
  0x90   : > { %2720 = shalt.err (!%p2717_p4)
}
  0x91   : > { %2566 = dma.hbm_to_vmem [thread:$0]  (!%p2963_p8), %s3083_s12, 2048, %s3086_s26, %s707_s21, %s3524_s18, %s3524_s18, %s3523_s16  }
  0x92   : > { %p3526_p12 = scmp.ne.s32.totalorder %s3520_s19, 0 }
  0x93   : > { %s737_s20 = sand.u32 (!%p3526_p12), 1, %s2783_s25   ;;  %p3527_p5 = scmp.ne.s32.totalorder (!%p3526_p12), %s3514_s30, 0 }
  0x94   : > { %735 = sbr.rel (%p3526_p12) target bundleno = 2201 (0x899), region = 104  ;;  %s2151_s10 = sshll.u32 (!%p3526_p12), %s737_s20, 7 }
  0x95   : > { %s738_s4 = scalar_lea.sflag (!%p3526_p12), [#allocation5], %s737_s20  ;;  %s3115_s2 = scalar_lea.vmem (!%p3526_p12), [#allocation4], %s2151_s10 }
  0x99   : > { %2762 = dma.done.wait (%p3527_p5), %s738_s4, 2048  }
  0x9a   : > { %2764 = vsyncadd (%p3527_p5), %s738_s4, 4294965248  ;;  %s746_s1 = sand.u32 1, %s2933_s3   ;;  %s3122_s16 = scalar_lea.vmem [#allocation7], %s2151_s10 }
  0x9b   : > { %s747_s24 = scalar_lea.sflag [#allocation8], %s746_s1 }
  0x9c   : > { %2766 = dma.done.wait (%p3527_p5), %s747_s24, 4096  }
  0x9d   : > { %2768 = vsyncadd (%p3527_p5), %s747_s24, 4294963200  ;;  %s3128_s19 = scalar_lea.vmem [#allocation9], %s2151_s10  ;;  %s765_s18 = scalar_lea.sflag [#allocation11], %s737_s20 }
  0x9e   : > { %s3130_s12 = scalar_lea.vmem [#allocation10], %s2151_s10 }
  0x9f   : > { %2770 = dma.done.wait (%p3527_p5), %s765_s18, 2048  }
  0xa0   : > { %2772 = vsyncadd (%p3527_p5), %s765_s18, 4294965248  ;;  %p859_p8 = scmp.lt.s32.totalorder %s2933_s3, 4  ;;  %s3528_s29 = sld [smem:[#allocation31_spill]] }
  0xa1   : > { %s3529_s27 = sld [smem:[#allocation33_spill]]  ;;  %p2156_p6 = scmp.ne.s32.totalorder %s2933_s3, 0 }
  0xa2   : > { %s3140_s26 = scalar_select %p859_p8, %s2933_s3, 4 }
  0xa3   : > { %884 = sbr.rel (%p2156_p6) target bundleno = 174 (0xae), region = 124  ;;  %s3530_s22 = sld [smem:[#allocation20_spill]] (!%p2156_p6) }
  0xa4   : > { %s2155_s21 = sshll.u32 %s3140_s26, 3  ;;  %s868_s0 = scalar_lea.vmem %s3471_s11, %s3140_s26 }
  0xa5   : > { %s862_s23 = scalar_lea.vmem %s3468_s8, %s2155_s21  ;;  %s874_s24 = scalar_lea.vmem %s3474_s14, %s3140_s26 }
  0xa6   : > { %s877_s28 = scalar_lea.vmem %s3528_s29, %s3140_s26  ;;  %s3531_s10 = sld [smem:[#allocation21_spill]] (!%p2156_p6) }
  0xa7   : > { %s880_s21 = scalar_lea.vmem %s3529_s27, %s3140_s26 }
  0xa9   : > { %v885_v0 = vld [vmem:[%s3530_s22] sm:$0xff]  ;;  %v886_v1 = vld [vmem:[%s3530_s22 + $0x8] sm:$0xff] }
  0xaa   : > { %887 = vst [vmem:[#allocation2] sm:$0xff] %v885_v0  ;;  %888 = vst [vmem:[#allocation2 + $0x8] sm:$0xff] %v886_v1 }
  0xac   : > { %v889_v2 = vld [vmem:[%s3531_s10] sm:$0x3] }
  0xad   : > { %890 = vst [vmem:[#allocation3] sm:$0x3] %v889_v2 }
  0xae PF: > { %vm905_vm0 = vcmask 1041408   ;;  %s3532_s30 = sld [smem:[#allocation22_spill]]  ;;  %vm898_vm1 = vcmask 15360   ;;  %v990_v7 = vld [vmem:[%s862_s23] sm:$0xff]  ;;  %vm998_vm2 = vcmask 64512   ;;  %vm1104_vm3 = vcmask 130048   ;;  %s3536_s6 = scalar_lea.vmem %s3469_s9, %s3140_s26 }
  0xaf   : > { %2324 = vmatprep.subr.mxu1 %v990_v7  ;;  %s3533_s29 = sld [smem:[#allocation27_spill]]  ;;  %vm1210_vm4 = vcmask 261120   ;;  %v1318_v26 = vld [vmem:[%s3115_s2 + $0x78] sm:$0xff]  ;;  %v1317_v27 = vld [vmem:[%s3115_s2 + $0x70] sm:$0xff]  ;;  %v1316_v28 = vld [vmem:[%s3115_s2 + $0x68] sm:$0xff]  ;;  %s3537_s17 = scalar_lea.vmem %s3473_s13, %s3140_s26 }
  0xb0   : > { %2325 = vmatpush3.msra.mxu1 %v990_v7  ;;  %s3534_s20 = sld [smem:[#allocation25_spill]]  ;;  %v1315_v29 = vld [vmem:[%s3115_s2 + $0x60] sm:$0xff]  ;;  %v1314_v30 = vld [vmem:[%s3115_s2 + $0x58] sm:$0xff]  ;;  %v1313_v31 = vld [vmem:[%s3115_s2 + $0x50] sm:$0xff]  ;;  %p2174_p11 = scmp.ge.s32.totalorder %s2933_s3, 4 }
  0xb1   : > { %v892_v14 = vld [vmem:[#allocation2 + $0x8] sm:$0xff]  ;;  %v891_v16 = vld [vmem:[#allocation2] sm:$0xff]  ;;  %s3535_s27 = sld [smem:[#allocation26_spill]]  ;;  %v1311_v33 = vld [vmem:[%s3115_s2 + $0x40] sm:$0xff] }
  0xb2   : > { %v1312_v32 = vld [vmem:[%s3115_s2 + $0x48] sm:$0xff]  ;;  %v1310_v34 = vld [vmem:[%s3115_s2 + $0x38] sm:$0xff]  ;;  %v1309_v35 = vld [vmem:[%s3115_s2 + $0x30] sm:$0xff] }
  0xb3   : > { %v1308_v36 = vld [vmem:[%s3115_s2 + $0x28] sm:$0xff]  ;;  %v1307_v37 = vld [vmem:[%s3115_s2 + $0x20] sm:$0xff]  ;;  %v1306_v38 = vld [vmem:[%s3115_s2 + $0x18] sm:$0xff] }
  0xb4   : > { %v3180_v3 = vld [vmem:[#allocation3] sm:$0x3]  ;;  %v2190_v4 = vld [vmem:[%s3532_s30] sm:$0xff]   ;;  %v1303_v63 = vld [vmem:[%s3115_s2] sm:$0xff]  ;;  %s3538_s30 = sld [smem:[#allocation23_spill]] (!%p2174_p11) }
  0xb5   : > { %2319 = vmatprep.subr.msk.mxu0 %vm905_vm0, %v3180_v3  ;;  %v2191_v5 = vunpack.c.l.bf16 %v2190_v4  ;;  %v2192_v6 = vunpack.c.h.bf16 %v2190_v4  ;;  %v986_v8 = vld [vmem:[%s3533_s29] sm:$0xff]  ;;  %v987_v9 = vld [vmem:[%s3533_s29 + $0x8] sm:$0xff]  ;;  %v988_v12 = vld [vmem:[%s3533_s29 + $0x10] sm:$0xff] }
  0xb6   : > { %2320 = vmatpush3.msk.msra.mxu0 %vm905_vm0, %v3180_v3  ;;  %2326 = vmatprep.mubr.msk.f32.mxu1 %vm998_vm2, %v986_v8  ;;  %v2194_v10 = vld [vmem:[%s3534_s20] sm:$0xff]   ;;  %v989_v13 = vld [vmem:[%s3533_s29 + $0x18] sm:$0xff]  ;;  %v2205_v18 = vld [vmem:[%s3534_s20 + $0x8] sm:$0xff]  }
  0xb7   : > { %2321 = vmatprep.mubr.msk.f32.mxu0 %vm898_vm1, %v2191_v5  ;;  %2327 = vmatmul.mubr.msk.f32.vlgmr.msra.gmra.mxu1 %vm998_vm2, %v987_v9  ;;  %v2195_v11 = vunpack.c.l.bf16 %v2194_v10  ;;  %v2196_v21 = vunpack.c.h.bf16 %v2194_v10  ;;  %v2199_v22 = vunpack.c.l.bf16 %v2205_v18  ;;  %v2200_v23 = vunpack.c.h.bf16 %v2205_v18  ;;  %v3220_v24 = vld [vmem:[%s3535_s27] sm:$0xff]   ;;  %v1418_v0 = vld [vmem:[%s3122_s16 + $0x78] sm:$0xff]  ;;  %v1415_v4 = vld [vmem:[%s3122_s16 + $0x60] sm:$0xff] }
  0xb8   : > { %2322 = vmatmul.mubr.msk.f32.vlgmr.msra.gmra.mxu0 %vm898_vm1, %v2192_v6  ;;  %2329 = vmatprep.mubr.msk.f32.mxu1 %vm998_vm2, %v988_v12  ;;  %v2203_v25 = vunpack.c.l.bf16 %v3220_v24  ;;  %v2160_v42 = vld [vmem:[%s3536_s6] ss:$0 sm:$0xff]  ;;  %v2204_v60 = vunpack.c.h.bf16 %v3220_v24  ;;  %v1305_v61 = vld [vmem:[%s3115_s2 + $0x10] sm:$0xff]  ;;  %v1414_v5 = vld [vmem:[%s3122_s16 + $0x58] sm:$0xff] }
  0xb9   : > { %2336 = vmatprep.mubr.msk.f32.mxu0 %vm1104_vm3, %v2195_v11  ;;  %v1304_v62 = vld [vmem:[%s3115_s2 + $0x8] sm:$0xff]  ;;  %v1417_v1 = vld [vmem:[%s3122_s16 + $0x70] sm:$0xff]  ;;  %v1411_v8 = vld [vmem:[%s3122_s16 + $0x40] sm:$0xff] }
  0xba   : > { %v1416_v2 = vld [vmem:[%s3122_s16 + $0x68] sm:$0xff]  ;;  %v1413_v6 = vld [vmem:[%s3122_s16 + $0x50] sm:$0xff]  ;;  %v1410_v9 = vld [vmem:[%s3122_s16 + $0x38] sm:$0xff] }
  0xbb   : > { %2330 = vmatmul.mubr.msk.f32.gmra.mxu1 %vm998_vm2, %v989_v13  ;;  %v1412_v7 = vld [vmem:[%s3122_s16 + $0x48] sm:$0xff]  ;;  %v1409_v10 = vld [vmem:[%s3122_s16 + $0x30] sm:$0xff]  ;;  %v1407_v12 = vld [vmem:[%s3122_s16 + $0x20] sm:$0xff] }
  0xbc   : > { %2350 = vmatprep.mubr.msk.f32.mxu1 %vm1210_vm4, %v2203_v25  ;;  %v1408_v11 = vld [vmem:[%s3122_s16 + $0x28] sm:$0xff]  ;;  %v1403_v25 = vld [vmem:[%s3122_s16] sm:$0xff] }
  0xbd   : > { %v2171_v13 = vld [vmem:[%s874_s24] ss:$0 sm:$0xff] }
  0xbe   : > { %v1404_v24 = vld [vmem:[%s3122_s16 + $0x8] sm:$0xff] }
 0x177   : > { %v2328_v39 = vpop.f32.mrf.mxu1 }
 0x178   : > { %v2323_v15 = vpop.f32.mrf.mxu0  ;;  %v1083_v47 = vadd.f32 %v2328_v39, %v2160_v42 }
 0x179   : > { %v3203_v17 = vadd.f32 %v2323_v15, %v892_v14  ;;  %v1077_v40 = vpop.f32.mrf.mxu1 }
 0x17a   : > { %v975_v19 = vpop.f32.mrf.mxu0  ;;  %v1078_v52 = vadd.f32 %v2160_v42, %v1077_v40 }
 0x17b   : > { %v3208_v20 = vadd.f32 %v975_v19, %v891_v16  ;;  %2332 = vmatprep.subr.mxu0 %v3203_v17  ;;  %v2331_v41 = vpop.f32.mrf.mxu1  ;;  %v1300_v16 = vmul.f32 %v2171_v13, %v3203_v17 }
 0x17c   : > { %2333 = vmatpush3.msra.mxu0 %v3203_v17  ;;  %v1093_v44 = vadd.f32 %v2331_v41, %v2160_v42 }
 0x17d   : > { %2334 = vmatprep.subr.mxu0 %v3208_v20  ;;  %v1087_v45 = vpop.f32.mrf.mxu1  ;;  %v1299_v15 = vmul.f32 %v2171_v13, %v3208_v20 }
 0x17e   : > { %2335 = vmatpush3.msra.mxu0 %v3208_v20  ;;  %v1088_v49 = vadd.f32 %v2160_v42, %v1087_v45 }
 0x17f   : > { %2337 = vmatmul.mubr.msk.f32.vlgmr.msra.gmra.mxu0 %vm1104_vm3, %v2196_v21  ;;  %2353 = vmatprep.subr.mxu0 %v1318_v26 }
 0x180   : > { %2339 = vmatprep.mubr.msk.f32.mxu0 %vm1104_vm3, %v2199_v22  ;;  %2354 = vmatpush3.msra.mxu0 %v1318_v26  ;;  %v1406_v22 = vld [vmem:[%s3122_s16 + $0x18] sm:$0xff]  ;;  %v2172_v26 = vld [vmem:[%s868_s0] ss:$0 sm:$0xff] }
 0x181   : > { %2355 = vmatprep.subr.mxu0 %v1317_v27 }
 0x182   : > { %2356 = vmatpush3.msra.mxu0 %v1317_v27 }
 0x183   : > { %2340 = vmatmul.mubr.msk.f32.gmra.mxu0 %vm1104_vm3, %v2200_v23  ;;  %2357 = vmatprep.subr.mxu0 %v1316_v28  ;;  %v1405_v23 = vld [vmem:[%s3122_s16 + $0x10] sm:$0xff] }
 0x184   : > { %2358 = vmatpush3.msra.mxu0 %v1316_v28 }
 0x185   : > { %2359 = vmatprep.subr.mxu0 %v1315_v29 }
 0x186   : > { %2360 = vmatpush3.msra.mxu0 %v1315_v29 }
 0x187   : > { %2361 = vmatprep.subr.mxu0 %v1314_v30 }
 0x188   : > { %2362 = vmatpush3.msra.mxu0 %v1314_v30 }
 0x189   : > { %2363 = vmatprep.subr.mxu0 %v1313_v31 }
 0x18a   : > { %2364 = vmatpush3.msra.mxu0 %v1313_v31 }
 0x18b   : > { %2365 = vmatprep.subr.mxu0 %v1312_v32 }
 0x18c   : > { %2366 = vmatpush3.msra.mxu0 %v1312_v32 }
 0x18d   : > { %2367 = vmatprep.subr.mxu0 %v1311_v33 }
 0x18e   : > { %2368 = vmatpush3.msra.mxu0 %v1311_v33  ;;  %v2173_v33 = vld [vmem:[%s3537_s17] ss:$0 sm:$0xff] }
 0x18f   : > { %2369 = vmatprep.subr.mxu0 %v1310_v34 }
 0x190   : > { %2370 = vmatpush3.msra.mxu0 %v1310_v34 }
 0x191   : > { %2371 = vmatprep.subr.mxu0 %v1309_v35 }
 0x192   : > { %2372 = vmatpush3.msra.mxu0 %v1309_v35 }
 0x193   : > { %2373 = vmatprep.subr.mxu0 %v1308_v36 }
 0x194   : > { %2374 = vmatpush3.msra.mxu0 %v1308_v36 }
 0x195   : > { %2375 = vmatprep.subr.mxu0 %v1307_v37 }
 0x196   : > { %2376 = vmatpush3.msra.mxu0 %v1307_v37 }
 0x197   : > { %2377 = vmatprep.subr.mxu0 %v1306_v38 }
 0x198   : > { %2378 = vmatpush3.msra.mxu0 %v1306_v38 }
 0x199   : > { %2379 = vmatprep.subr.mxu0 %v1305_v61 }
 0x19a   : > { %2380 = vmatpush3.msra.mxu0 %v1305_v61 }
 0x19b   : > { %2381 = vmatprep.subr.mxu0 %v1304_v62 }
 0x19c   : > { %2382 = vmatpush3.msra.mxu0 %v1304_v62 }
 0x19d   : > { %2383 = vmatprep.subr.mxu0 %v1303_v63 }
 0x19e   : > { %2384 = vmatpush3.msra.mxu0 %v1303_v63 }
 0x23f   : > { %v2338_v43 = vpop.f32.mrf.mxu0 }
 0x240   : > { %v1189_v53 = vadd.f32 %v2338_v43, %v1083_v47 }
 0x241   : > { %v1183_v46 = vpop.f32.mrf.mxu0 }
 0x242   : > { %v1184_v56 = vadd.f32 %v1183_v46, %v1078_v52  ;;  %v1203_v58 = vmax.f32 %v1189_v53, 0.0 }
 0x243   : > { %v2341_v48 = vpop.f32.mrf.mxu0 }
 0x244   : > { %v1199_v50 = vadd.f32 %v2341_v48, %v1093_v44  ;;  %v1202_v59 = vmax.f32 %v1184_v56, 0.0 }
 0x245   : > { %v1193_v51 = vpop.f32.mrf.mxu0 }
 0x246   : > { %v1205_v54 = vmax.f32 %v1199_v50, 0.0  ;;  %v1194_v55 = vadd.f32 %v1193_v51, %v1088_v49 }
 0x248   : > { %v1204_v57 = vmax.f32 %v1194_v55, 0.0  ;;  %2342 = vmatprep.subr.mxu1 %v1205_v54 }
 0x249   : > { %2343 = vmatpush3.msra.mxu1 %v1205_v54 }
 0x24a   : > { %2344 = vmatprep.subr.mxu1 %v1204_v57 }
 0x24b   : > { %2345 = vmatpush3.msra.mxu1 %v1204_v57 }
 0x24c   : > { %2346 = vmatprep.subr.mxu1 %v1203_v58 }
 0x24d   : > { %2347 = vmatpush3.msra.mxu1 %v1203_v58 }
 0x24e   : > { %2348 = vmatprep.subr.mxu1 %v1202_v59 }
 0x24f   : > { %2349 = vmatpush3.msra.mxu1 %v1202_v59 }
 0x250   : > { %2351 = vmatmul.mubr.msk.f32.vlgmr.msra.gmra.mxu1 %vm1210_vm4, %v2204_v60  ;;  %2388 = vmatprep.subr.mxu1 %v1418_v0 }
 0x251   : > { %2389 = vmatpush3.msra.mxu1 %v1418_v0 }
 0x252   : > { %2390 = vmatprep.subr.mxu1 %v1417_v1 }
 0x253   : > { %2391 = vmatpush3.msra.mxu1 %v1417_v1 }
 0x254   : > { %2392 = vmatprep.subr.mxu1 %v1416_v2 }
 0x255   : > { %2393 = vmatpush3.msra.mxu1 %v1416_v2 }
 0x256   : > { %2394 = vmatprep.subr.mxu1 %v1415_v4 }
 0x257   : > { %2395 = vmatpush3.msra.mxu1 %v1415_v4 }
 0x258   : > { %2396 = vmatprep.subr.mxu1 %v1414_v5 }
 0x259   : > { %2397 = vmatpush3.msra.mxu1 %v1414_v5 }
 0x25a   : > { %2398 = vmatprep.subr.mxu1 %v1413_v6 }
 0x25b   : > { %2399 = vmatpush3.msra.mxu1 %v1413_v6 }
 0x25c   : > { %2400 = vmatprep.subr.mxu1 %v1412_v7 }
 0x25d   : > { %2401 = vmatpush3.msra.mxu1 %v1412_v7 }
 0x25e   : > { %2402 = vmatprep.subr.mxu1 %v1411_v8 }
 0x25f   : > { %2403 = vmatpush3.msra.mxu1 %v1411_v8 }
 0x260   : > { %2404 = vmatprep.subr.mxu1 %v1410_v9 }
 0x261   : > { %2405 = vmatpush3.msra.mxu1 %v1410_v9 }
 0x262   : > { %2406 = vmatprep.subr.mxu1 %v1409_v10 }
 0x263   : > { %2407 = vmatpush3.msra.mxu1 %v1409_v10 }
 0x264   : > { %2408 = vmatprep.subr.mxu1 %v1408_v11 }
 0x265   : > { %2409 = vmatpush3.msra.mxu1 %v1408_v11 }
 0x266   : > { %2410 = vmatprep.subr.mxu1 %v1407_v12 }
 0x267   : > { %2411 = vmatpush3.msra.mxu1 %v1407_v12 }
 0x268   : > { %2412 = vmatprep.subr.mxu1 %v1406_v22 }
 0x269   : > { %2413 = vmatpush3.msra.mxu1 %v1406_v22 }
 0x26a   : > { %2414 = vmatprep.subr.mxu1 %v1405_v23 }
 0x26b   : > { %2415 = vmatpush3.msra.mxu1 %v1405_v23 }
 0x26c   : > { %2416 = vmatprep.subr.mxu1 %v1404_v24 }
 0x26d   : > { %2417 = vmatpush3.msra.mxu1 %v1404_v24 }
 0x26e   : > { %2418 = vmatprep.subr.mxu1 %v1403_v25 }
 0x26f   : > { %2419 = vmatpush3.msra.mxu1 %v1403_v25 }
 0x310   : > { %v2352_v14 = vpop.f32.mrf.mxu1 }
 0x311   : > { %v1302_v21 = vadd.f32 %v2352_v14, %v1300_v16 }
 0x312   : > { %v1283_v18 = vpop.f32.mrf.mxu1 }
 0x313   : > { %v1301_v19 = vadd.f32 %v1299_v15, %v1283_v18 }
 0x315   : > { %2385 = vmatprep.mubr.f32.mxu0 %v1301_v19 }
 0x316   : > { %2386 = vmatmul.mubr.f32.vlgmr.msra.gmra.mxu0 %v1302_v21 }
 0x3d6   : > { %v2387_v27 = vpop.f32.mrf.mxu0 }
 0x3d7   : > { %v1398_v28 = vadd.f32 %v2387_v27, %v2172_v26 }
 0x3d8   : > { %v1392_v29 = vpop.f32.mrf.mxu0 }
 0x3d9   : > { %v1393_v30 = vadd.f32 %v2172_v26, %v1392_v29  ;;  %v1402_v32 = vmax.f32 %v1398_v28, 0.0 }
 0x3db   : > { %v1401_v31 = vmax.f32 %v1393_v30, 0.0 }
 0x3dd   : > { %2420 = vmatprep.mubr.f32.mxu1 %v1401_v31 }
 0x3de   : > { %2421 = vmatmul.mubr.f32.vlgmr.msra.gmra.mxu1 %v1402_v32 }
 0x49d   : > { %1504 = sbr.rel (%p2174_p11) target bundleno = 1781 (0x6f5), region = 128 }
 0x49e   : > { %v2422_v34 = vpop.f32.mrf.mxu1 }
 0x49f   : > { %v3280_v35 = vadd.f32 %v2422_v34, %v2173_v33 }
 0x4a0   : > { %v1492_v36 = vpop.f32.mrf.mxu1 }
 0x4a1   : > { %v3282_v37 = vadd.f32 %v2173_v33, %v1492_v36 }
 0x4a2   : > { %v1506_v39 = vmax.f32 %v3280_v35, 0.0  ;;  %v1509_v40 = vld [vmem:[%s3538_s30] sm:$0x1]  ;;  %v2799_v41 = vmov 0.0   ;;  %vm2800_vm5 = vmmov 0   ;;  %v1599_v43 = vld [vmem:[%s3128_s19 + $0x78] sm:$0xff] }
 0x4a3   : > { %v1505_v38 = vmax.f32 %v3282_v37, 0.0  ;;  %2423 = vmatprep.subr.mxu0 %v2799_v41  ;;  %2427 = vmatprep.mubr.msk.f32.mxu0 %vm2800_vm5, %v2799_v41  ;;  %v1510_v42 = vunpack.c.l.bf16 %v1509_v40  ;;  %v1598_v44 = vld [vmem:[%s3128_s19 + $0x70] sm:$0xff]  ;;  %v1597_v45 = vld [vmem:[%s3128_s19 + $0x68] sm:$0xff]  ;;  %v1592_v48 = vld [vmem:[%s3128_s19 + $0x40] sm:$0xff] }
 0x4a4   : > { %1508 = vst [vmem:[#allocation2 + $0x8] sm:$0xff] %v1506_v39  ;;  %2424 = vmatpush3.msra.mxu0 %v3203_v17  ;;  %2430 = vmatprep.subr.mxu1 %v2799_v41  ;;  %v1596_v17 = vld [vmem:[%s3128_s19 + $0x60] sm:$0xff]  ;;  %v1594_v46 = vld [vmem:[%s3128_s19 + $0x50] sm:$0xff]  ;;  %v1593_v47 = vld [vmem:[%s3128_s19 + $0x48] sm:$0xff] }
 0x4a5   : > { %1507 = vst [vmem:[#allocation2] sm:$0xff] %v1505_v38  ;;  %2425 = vmatprep.subr.mxu0 %v2799_v41  ;;  %2431 = vmatpush3.msra.mxu1 %v1599_v43  ;;  %v1591_v49 = vld [vmem:[%s3128_s19 + $0x38] sm:$0xff]  ;;  %v1590_v50 = vld [vmem:[%s3128_s19 + $0x30] sm:$0xff]  ;;  %v1589_v51 = vld [vmem:[%s3128_s19 + $0x28] sm:$0xff] }
 0x4a6   : > { %2426 = vmatpush3.msra.mxu0 %v3208_v20  ;;  %2432 = vmatprep.subr.mxu1 %v2799_v41  ;;  %v1595_v20 = vld [vmem:[%s3128_s19 + $0x58] sm:$0xff]  ;;  %v1588_v52 = vld [vmem:[%s3128_s19 + $0x20] sm:$0xff]  ;;  %v1586_v54 = vld [vmem:[%s3128_s19 + $0x10] sm:$0xff] }
 0x4a7   : > { %2428 = vmatmul.mubr.msk.f32.vlgmr.msra.gmra.mxu0 %vm1104_vm3, %v1510_v42  ;;  %2433 = vmatpush3.msra.mxu1 %v1598_v44  ;;  %v1587_v53 = vld [vmem:[%s3128_s19 + $0x18] sm:$0xff]  ;;  %v1585_v55 = vld [vmem:[%s3128_s19 + $0x8] sm:$0xff]  ;;  %v1584_v56 = vld [vmem:[%s3128_s19] sm:$0xff] }
 0x4a8   : > { %2434 = vmatprep.subr.mxu1 %v2799_v41  ;;  %2462 = vmatprep.mubr.msk.f32.mxu1 %vm2800_vm5, %v2799_v41  ;;  %v1693_v57 = vld [vmem:[%s3130_s12 + $0x78] sm:$0xff]  ;;  %v1692_v58 = vld [vmem:[%s3130_s12 + $0x70] sm:$0xff]  ;;  %v1691_v59 = vld [vmem:[%s3130_s12 + $0x68] sm:$0xff] }
 0x4a9   : > { %2435 = vmatpush3.msra.mxu1 %v1597_v45  ;;  %2465 = vmatprep.subr.mxu0 %v2799_v41  ;;  %v1690_v60 = vld [vmem:[%s3130_s12 + $0x60] sm:$0xff]  ;;  %v1689_v61 = vld [vmem:[%s3130_s12 + $0x58] sm:$0xff]  ;;  %v1688_v62 = vld [vmem:[%s3130_s12 + $0x50] sm:$0xff] }
 0x4aa   : > { %2436 = vmatprep.subr.mxu1 %v2799_v41  ;;  %2497 = vmatprep.mubr.msk.f32.mxu0 %vm2800_vm5, %v2799_v41  ;;  %v1687_v63 = vld [vmem:[%s3130_s12 + $0x48] sm:$0xff]  ;;  %v1686_v0 = vld [vmem:[%s3130_s12 + $0x40] sm:$0xff]  ;;  %v1685_v1 = vld [vmem:[%s3130_s12 + $0x38] sm:$0xff] }
 0x4ab   : > { %2437 = vmatpush3.msra.mxu1 %v1596_v17  ;;  %2466 = vmatpush3.msra.mxu0 %v1693_v57  ;;  %v1684_v2 = vld [vmem:[%s3130_s12 + $0x30] sm:$0xff]  ;;  %v1683_v4 = vld [vmem:[%s3130_s12 + $0x28] sm:$0xff]  ;;  %v1682_v5 = vld [vmem:[%s3130_s12 + $0x20] sm:$0xff] }
 0x4ac   : > { %2438 = vmatprep.subr.mxu1 %v2799_v41  ;;  %2467 = vmatprep.subr.mxu0 %v2799_v41  ;;  %v1681_v6 = vld [vmem:[%s3130_s12 + $0x18] sm:$0xff]  ;;  %v1680_v10 = vld [vmem:[%s3130_s12 + $0x10] sm:$0xff]  ;;  %v1679_v11 = vld [vmem:[%s3130_s12 + $0x8] sm:$0xff] }
 0x4ad   : > { %2439 = vmatpush3.msra.mxu1 %v1595_v20  ;;  %2468 = vmatpush3.msra.mxu0 %v1692_v58  ;;  %v1678_v12 = vld [vmem:[%s3130_s12] sm:$0xff]  ;;  %v2176_v13 = vld [vmem:[%s877_s28] ss:$0 sm:$0xff] }
 0x4ae   : > { %2440 = vmatprep.subr.mxu1 %v2799_v41  ;;  %2469 = vmatprep.subr.mxu0 %v2799_v41  ;;  %v2177_v18 = vld [vmem:[%s880_s21] ss:$0 sm:$0xff] }
 0x4af   : > { %2441 = vmatpush3.msra.mxu1 %v1594_v46  ;;  %2470 = vmatpush3.msra.mxu0 %v1691_v59 }
 0x4b0   : > { %2442 = vmatprep.subr.mxu1 %v2799_v41  ;;  %2471 = vmatprep.subr.mxu0 %v2799_v41 }
 0x4b1   : > { %2443 = vmatpush3.msra.mxu1 %v1593_v47  ;;  %2472 = vmatpush3.msra.mxu0 %v1690_v60 }
 0x4b2   : > { %2444 = vmatprep.subr.mxu1 %v2799_v41  ;;  %2473 = vmatprep.subr.mxu0 %v2799_v41 }
 0x4b3   : > { %2445 = vmatpush3.msra.mxu1 %v1592_v48  ;;  %2474 = vmatpush3.msra.mxu0 %v1689_v61 }
 0x4b4   : > { %2446 = vmatprep.subr.mxu1 %v2799_v41  ;;  %2475 = vmatprep.subr.mxu0 %v2799_v41 }
 0x4b5   : > { %2447 = vmatpush3.msra.mxu1 %v1591_v49  ;;  %2476 = vmatpush3.msra.mxu0 %v1688_v62 }
 0x4b6   : > { %2448 = vmatprep.subr.mxu1 %v2799_v41  ;;  %2477 = vmatprep.subr.mxu0 %v2799_v41 }
 0x4b7   : > { %2449 = vmatpush3.msra.mxu1 %v1590_v50  ;;  %2478 = vmatpush3.msra.mxu0 %v1687_v63 }
 0x4b8   : > { %2450 = vmatprep.subr.mxu1 %v2799_v41  ;;  %2479 = vmatprep.subr.mxu0 %v2799_v41 }
 0x4b9   : > { %2451 = vmatpush3.msra.mxu1 %v1589_v51  ;;  %2480 = vmatpush3.msra.mxu0 %v1686_v0 }
 0x4ba   : > { %2452 = vmatprep.subr.mxu1 %v2799_v41  ;;  %2481 = vmatprep.subr.mxu0 %v2799_v41 }
 0x4bb   : > { %2453 = vmatpush3.msra.mxu1 %v1588_v52  ;;  %2482 = vmatpush3.msra.mxu0 %v1685_v1 }
 0x4bc   : > { %2454 = vmatprep.subr.mxu1 %v2799_v41  ;;  %2483 = vmatprep.subr.mxu0 %v2799_v41 }
 0x4bd   : > { %2455 = vmatpush3.msra.mxu1 %v1587_v53  ;;  %2484 = vmatpush3.msra.mxu0 %v1684_v2 }
 0x4be   : > { %2456 = vmatprep.subr.mxu1 %v2799_v41  ;;  %2485 = vmatprep.subr.mxu0 %v2799_v41 }
 0x4bf   : > { %2457 = vmatpush3.msra.mxu1 %v1586_v54  ;;  %2486 = vmatpush3.msra.mxu0 %v1683_v4 }
 0x4c0   : > { %2458 = vmatprep.subr.mxu1 %v2799_v41  ;;  %2487 = vmatprep.subr.mxu0 %v2799_v41 }
 0x4c1   : > { %2459 = vmatpush3.msra.mxu1 %v1585_v55  ;;  %2488 = vmatpush3.msra.mxu0 %v1682_v5 }
 0x4c2   : > { %2460 = vmatprep.subr.mxu1 %v2799_v41  ;;  %2489 = vmatprep.subr.mxu0 %v2799_v41 }
 0x4c3   : > { %2461 = vmatpush3.msra.mxu1 %v1584_v56  ;;  %2490 = vmatpush3.msra.mxu0 %v1681_v6 }
 0x4c4   : > { %2491 = vmatprep.subr.mxu0 %v2799_v41 }
 0x4c5   : > { %2492 = vmatpush3.msra.mxu0 %v1680_v10 }
 0x4c6   : > { %2493 = vmatprep.subr.mxu0 %v2799_v41 }
 0x4c7   : > { %2494 = vmatpush3.msra.mxu0 %v1679_v11 }
 0x4c8   : > { %2495 = vmatprep.subr.mxu0 %v2799_v41 }
 0x4c9   : > { %2496 = vmatpush3.msra.mxu0 %v1678_v12 }
 0x567   : > { %v1580_v7 = vpop.f32.mrf.mxu0 }
 0x568   : > { %v1581_v8 = vadd.f32 %v1580_v7, %v3180_v3 }
 0x569   : > { %v2429_v9 = vpop.f32.mrf.mxu0 }
 0x56a   : > { %2463 = vmatmul.mubr.f32.vlgmr.msra.gmra.mxu1 %v1581_v8 }
 0x62a   : > { %v1673_v14 = vpop.f32.mrf.mxu1 }
 0x62b   : > { %v1674_v3 = vadd.f32 %v2176_v13, %v1673_v14 }
 0x62c   : > { %v2464_v15 = vpop.f32.mrf.mxu1 }
 0x62d   : > { %v1677_v16 = vmax.f32 %v1674_v3, 0.0 }
 0x62f   : > { %2498 = vmatmul.mubr.f32.vlgmr.msra.gmra.mxu0 %v1677_v16 }
 0x6ef   : > { %v1767_v19 = vpop.f32.mrf.mxu0 }
 0x6f0   : > { %v1768_v21 = vadd.f32 %v2177_v18, %v1767_v19 }
 0x6f1   : > { %v2499_v22 = vpop.f32.mrf.mxu0 }
 0x6f2   : > { %v1771_v23 = vmax.f32 %v1768_v21, 0.0 }
 0x6f4   : > { %1772 = vst [vmem:[#allocation3] sm:$0x3] %v1771_v23 }
 0x6f5 PF: > { %1776 = sbr.rel (%p859_p8) target bundleno = 2180 (0x884), region = 132  ;;  %s3541_s6 = sld [smem:[#allocation34_spill]] (!%p859_p8) }
 0x6f6   : > { %s3542_s2 = sld [smem:[#allocation24_spill]] (!%p859_p8) }
 0x6f7   : > { %s3543_s27 = sld [smem:[#allocation35_spill]] (!%p859_p8) }
 0x6fa   : > { %v2801_v25 = vmov 0.0   ;;  %vm2802_vm6 = vmmov 0   ;;  %vm1944_vm7 = vcmask 58368  }
 0x6fb   : > { %v1866_v24 = vld [vmem:[%s3541_s6 + $0x78] sm:$0xff]  ;;  %2500 = vmatprep.subr.mxu0 %v2801_v25  ;;  %2504 = vmatprep.mubr.msk.f32.mxu0 %vm2802_vm6, %v2801_v25  ;;  %v1865_v27 = vld [vmem:[%s3541_s6 + $0x70] sm:$0xff]  ;;  %v1864_v28 = vld [vmem:[%s3541_s6 + $0x68] sm:$0xff] }
 0x6fc   : > { %2501 = vmatpush3.msra.mxu0 %v3280_v35  ;;  %v1777_v26 = vld [vmem:[%s3542_s2] sm:$0x3]  ;;  %2507 = vmatprep.subr.mxu1 %v2801_v25  ;;  %v1862_v30 = vld [vmem:[%s3541_s6 + $0x58] sm:$0xff]  ;;  %v1861_v31 = vld [vmem:[%s3541_s6 + $0x50] sm:$0xff] }
 0x6fd   : > { %2502 = vmatprep.subr.mxu0 %v2801_v25  ;;  %2508 = vmatpush3.msra.mxu1 %v1866_v24  ;;  %v1863_v29 = vld [vmem:[%s3541_s6 + $0x60] sm:$0xff]  ;;  %v1860_v32 = vld [vmem:[%s3541_s6 + $0x48] sm:$0xff]  ;;  %v1858_v34 = vld [vmem:[%s3541_s6 + $0x38] sm:$0xff] }
 0x6fe   : > { %2503 = vmatpush3.msra.mxu0 %v3282_v37  ;;  %2509 = vmatprep.subr.mxu1 %v2801_v25  ;;  %v1859_v33 = vld [vmem:[%s3541_s6 + $0x40] sm:$0xff]  ;;  %v1857_v35 = vld [vmem:[%s3541_s6 + $0x30] sm:$0xff]  ;;  %v1856_v36 = vld [vmem:[%s3541_s6 + $0x28] sm:$0xff] }
 0x6ff   : > { %2505 = vmatmul.mubr.msk.f32.vlgmr.msra.gmra.mxu0 %vm1104_vm3, %v1777_v26  ;;  %2510 = vmatpush3.msra.mxu1 %v1865_v27  ;;  %v1855_v37 = vld [vmem:[%s3541_s6 + $0x20] sm:$0xff]  ;;  %v1854_v38 = vld [vmem:[%s3541_s6 + $0x18] sm:$0xff]  ;;  %v1853_v39 = vld [vmem:[%s3541_s6 + $0x10] sm:$0xff] }
 0x700   : > { %2511 = vmatprep.subr.mxu1 %v2801_v25  ;;  %2539 = vmatprep.mubr.msk.f32.mxu1 %vm2802_vm6, %v2801_v25  ;;  %v1852_v40 = vld [vmem:[%s3541_s6 + $0x8] sm:$0xff]  ;;  %v1851_v41 = vld [vmem:[%s3541_s6] sm:$0xff] }
 0x701   : > { %2512 = vmatpush3.msra.mxu1 %v1864_v28  ;;  %v2180_v44 = vld [vmem:[%s3543_s27] ss:$0 sm:$0xff] }
 0x702   : > { %2513 = vmatprep.subr.mxu1 %v2801_v25 }
 0x703   : > { %2514 = vmatpush3.msra.mxu1 %v1863_v29 }
 0x704   : > { %2515 = vmatprep.subr.mxu1 %v2801_v25 }
 0x705   : > { %2516 = vmatpush3.msra.mxu1 %v1862_v30 }
 0x706   : > { %2517 = vmatprep.subr.mxu1 %v2801_v25 }
 0x707   : > { %2518 = vmatpush3.msra.mxu1 %v1861_v31 }
 0x708   : > { %2519 = vmatprep.subr.mxu1 %v2801_v25 }
 0x709   : > { %2520 = vmatpush3.msra.mxu1 %v1860_v32 }
 0x70a   : > { %2521 = vmatprep.subr.mxu1 %v2801_v25 }
 0x70b   : > { %2522 = vmatpush3.msra.mxu1 %v1859_v33 }
 0x70c   : > { %2523 = vmatprep.subr.mxu1 %v2801_v25 }
 0x70d   : > { %2524 = vmatpush3.msra.mxu1 %v1858_v34 }
 0x70e   : > { %2525 = vmatprep.subr.mxu1 %v2801_v25 }
 0x70f   : > { %2526 = vmatpush3.msra.mxu1 %v1857_v35 }
 0x710   : > { %2527 = vmatprep.subr.mxu1 %v2801_v25 }
 0x711   : > { %2528 = vmatpush3.msra.mxu1 %v1856_v36 }
 0x712   : > { %2529 = vmatprep.subr.mxu1 %v2801_v25 }
 0x713   : > { %2530 = vmatpush3.msra.mxu1 %v1855_v37 }
 0x714   : > { %2531 = vmatprep.subr.mxu1 %v2801_v25 }
 0x715   : > { %2532 = vmatpush3.msra.mxu1 %v1854_v38 }
 0x716   : > { %2533 = vmatprep.subr.mxu1 %v2801_v25 }
 0x717   : > { %2534 = vmatpush3.msra.mxu1 %v1853_v39 }
 0x718   : > { %2535 = vmatprep.subr.mxu1 %v2801_v25 }
 0x719   : > { %2536 = vmatpush3.msra.mxu1 %v1852_v40 }
 0x71a   : > { %2537 = vmatprep.subr.mxu1 %v2801_v25 }
 0x71b   : > { %2538 = vmatpush3.msra.mxu1 %v1851_v41 }
 0x7bf   : > { %v1847_v42 = vpop.f32.mrf.mxu0 }
 0x7c0   : > { %2540 = vmatmul.mubr.f32.vlgmr.msra.gmra.mxu1 %v1847_v42 }
 0x7c1   : > { %v2506_v43 = vpop.f32.mrf.mxu0 }
 0x880   : > { %v1940_v45 = vpop.f32.mrf.mxu1 }
 0x881   : > { %v1941_v17 = vadd.f32 %v2180_v44, %v1940_v45 }
 0x882   : > { %v2541_v20 = vpop.f32.mrf.mxu1 }
 0x883   : > { %1945 = vst.msk [vmem:[#allocation12] sm:$0x3] %vm1944_vm7, %v1941_v17 }
 0x884 PF: > { %p2568_p13 = scmp.eq.s32.totalorder %s2933_s3, 4  ;;  %s2803_s7 = smov [#allocation12]  }
 0x885   : > { %s1953_s5 = sshll.u32 %s2803_s7, 4  ;;  %s1954_s5 = int_to_ptr.vmem [resolvable:$true] %s1953_s5 }
 0x886   : > { %s2721_s12 = scalar_lea.vmem %s1954_s5, 32  ;;  %p2728_p1 = scmp.lt.s32.totalorder %s1954_s5, %s1954_s5 }
 0x887   : > { %p2722_p9 = scmp.ne.s32.totalorder %s1954_s5, %s2721_s12  ;;  %p2729_p2 = scmp.lt.s32.totalorder %s2721_s12, %s2721_s12 }
 0x889   : > { %p2723_p7 = pnand %p2722_p9, %p2568_p13  ;;  %p2730_p10 = por %p2729_p2, %p2728_p1 }
 0x88b   : > { %p2724_p0 = pneg %p2723_p7 }
 0x88d   : > { %p2731_p3 = pnand %p2730_p10, %p2724_p0 }
 0x88f   : > { %2734 = shalt.err (!%p2731_p3)
}
 0x890   : > { %s3544_s21 = sld [smem:[#allocation36_spill]] }
 0x896   : > { %2551 = dma.vmem_to_hbm [thread:$0]  (%p2568_p13), %s1954_s5, 32, %s3544_s21, [#allocation6]  }
 0x897   : > { %2774 = dma.done.wait (%p2568_p13), [#allocation6], 32  }
 0x898   : > { %2776 = vsyncadd (%p2568_p13), [#allocation6], 4294967264 }
 0x899 PF: > { %s3545_s27 = sld [smem:[#allocation18_spill]]  ;;  %s3548_s2 = smov %s2783_s25 }
 0x89a   : > { %s3546_s4 = sld [smem:[#allocation17_spill]] }
 0x89b   : > { %s3547_s26 = sld [smem:[#allocation19_spill]] }
 0x89f   : > { %p38_p4 = scmp.ge.s32.totalorder %s3545_s27, 7  }
 0x8a0   : > { %s3549_s25 = smov %s3546_s4 }
 0x8a1   :  { %40 = sbr.rel (!%p38_p4) target bundleno = 26 (0x1a), region = 211 }
 0x8a6   :  { %1966 = vsyncpa [#allocation5], 1 }
 0x8a7   :  { %1968 = vsyncpa [#allocation5 + $0x1], 1 }
 0x8a8   :  { %1969 = vsyncpa [#allocation8], 1 }
 0x8a9   :  { %1971 = vsyncpa [#allocation8 + $0x1], 1 }
 0x8aa   :  { %1972 = vsyncpa [#allocation11], 1 }
 0x8ab   :  { %1974 = vsyncpa [#allocation11 + $0x1], 1 }
 0x8ac   :  { %1975 = vsyncpa [#allocation6], 1 }
 0x8ad   :  { %1977 = vsyncpa [#allocation6 + $0x1], 1 }

</bundles_post_ra>
